<compile_context>
chip_gen: v5e
topology: v5e:2x2
jax: 0.10.0
libtpu: 0.0.40
codegen_flags: <defaults>
</compile_context>

<pallas_src>
import jax
import jax.numpy as jnp
from jax.experimental import pallas as pl
from jax.experimental.pallas import tpu as pltpu
import numpy as np

# ------------------------- small, module-consistent sizes -------------------------
B = 4           # batch (logical)
BP = 8          # batch padded to one full sublane tile
T = 8           # sequence length
E = 128         # embedding dim (module uses 300; shrunk but same structure)
H = 64          # hidden dim   (module uses 100; shrunk but same structure)
C = 5           # NUM_CLASSES = len(SENTIMENTS)
C_PAD = 128     # lane-padded classifier width
V = 50          # vocab size


# ------------------------------- Pallas kernel ------------------------------------
def _bilstm_kernel(x_ref,                 # (T*BP, 2E) bf16  [x_t | x_{T-1-t}] time-major flat
                   h0_ref, c0_ref,        # (BP, 2H) f32     [fwd | bwd] initial state
                   w_all_ref,             # (2E, 8H) bf16    stacked fwd/bwd input weights
                   b_all_ref,             # (1, 8H)  f32     both biases folded
                   whh_ref,               # (2H, 8H) bf16    block-diagonal recurrent weight
                   wfc_ref,               # (4H, C_PAD) bf16 stacked classifier weight
                   bfc_ref,               # (1, C_PAD) f32   bias (-1e30 in padded cols)
                   logp_ref,              # out: (BP, C_PAD) log-probabilities (lane-dense)
                   hcat_ref, ccat_ref,    # out: (BP, 2H) final h / c, [fwd | bwd]
                   xg_ref):               # scratch: (T*BP, 8H) f32 gate pre-activations
    nb = h0_ref.shape[0]          # BP
    h2 = h0_ref.shape[1]          # 2H
    t_steps = x_ref.shape[0] // nb

    # Hoisted input projection for BOTH directions and ALL steps: one K=2E matmul,
    # biases folded in. Elementwise / accumulation stays f32.
    xg_ref[...] = (jnp.dot(x_ref[...], w_all_ref[...],
                           preferred_element_type=jnp.float32)
                   + b_all_ref[...])

    whh = whh_ref[...]                                       # (2H, 8H) bf16, loop-invariant
    h = h0_ref[...]                                          # (BP, 2H) f32
    c = c0_ref[...]
    h_step0 = h                                              # overwritten at t == 0 (T >= 1)

    # Fused forward+backward recurrence, statically unrolled.
    # Step t: forward half processes time t, backward half processes time T-1-t.
    for t in range(t_steps):
        xg = xg_ref[pl.ds(t * nb, nb), :]                                   # (BP, 8H) f32
        gates = xg + jnp.dot(h.astype(jnp.bfloat16), whh,
                             preferred_element_type=jnp.float32)            # (BP, 8H) f32
        sig = jax.nn.sigmoid(gates[:, 0:3 * h2])                            # i|f|o both dirs
        g = jnp.tanh(gates[:, 3 * h2:4 * h2])                               # (BP, 2H)
        i2 = sig[:, 0:h2]
        f2 = sig[:, h2:2 * h2]
        o2 = sig[:, 2 * h2:3 * h2]
        c = f2 * c + i2 * g
        h = o2 * jnp.tanh(c)
        if t == 0:
            h_step0 = h           # backward hidden at original time T-1 lives in cols H:2H

    # Classifier head: one K=4H matmul on the lane-concatenated state.
    hc = jnp.concatenate([h, h_step0], axis=-1).astype(jnp.bfloat16)        # (BP, 4H)
    logits = (jnp.dot(hc, wfc_ref[...], preferred_element_type=jnp.float32)
              + bfc_ref[...])                                               # (BP, C_PAD)
    m = jnp.max(logits, axis=1, keepdims=True)
    z = logits - m
    logp_ref[...] = z - jnp.log(jnp.sum(jnp.exp(z), axis=1, keepdims=True))

    hcat_ref[...] = h
    ccat_ref[...] = c


# --------------------------------- wrapper ----------------------------------------
@jax.jit
def lstm_forward(token_ids, hidden, packed):
    """token_ids: (B, T) int32; hidden = (h0, c0) each (2, B, H); packed = pack_params(...)."""
    h0, c0 = hidden
    b_in = token_ids.shape[0]
    emb = packed["embedding"]                                     # (V, E), stays in HBM/XLA

    # Pad batch to BP (full sublane tile); gather time-major directly.
    ids_p = jnp.zeros((BP, T), token_ids.dtype).at[:b_in].set(token_ids)
    x_tbe = jnp.take(emb, ids_p.T, axis=0)                        # (T, BP, E)
    x_cat = jnp.concatenate([x_tbe, x_tbe[::-1]], axis=-1)        # (T, BP, 2E): [x_t | x_{T-1-t}]
    x2 = x_cat.reshape(T * BP, 2 * E).astype(jnp.bfloat16)

    h0_cat = jnp.zeros((BP, 2 * H), jnp.float32).at[:b_in].set(
        jnp.concatenate([h0[0], h0[1]], axis=-1))
    c0_cat = jnp.zeros((BP, 2 * H), jnp.float32).at[:b_in].set(
        jnp.concatenate([c0[0], c0[1]], axis=-1))

    vmem = pl.BlockSpec(memory_space=pltpu.MemorySpace.VMEM)
    logp_p, h_cat, c_cat = pl.pallas_call(
        _bilstm_kernel,
        out_shape=(
            jax.ShapeDtypeStruct((BP, C_PAD), jnp.float32),
            jax.ShapeDtypeStruct((BP, 2 * H), jnp.float32),
            jax.ShapeDtypeStruct((BP, 2 * H), jnp.float32),
        ),
        in_specs=[vmem] * 8,
        out_specs=(vmem, vmem, vmem),
        scratch_shapes=[pltpu.VMEM((T * BP, 8 * H), jnp.float32)],
    )(x2, h0_cat, c0_cat,
      packed["w_all"], packed["b_all"], packed["whh"],
      packed["wfc"], packed["bfc"])

    logp = logp_p[:b_in, :C]
    h_n = jnp.stack([h_cat[:b_in, :H], h_cat[:b_in, H:]], axis=0)   # (2, B, H) PyTorch order
    c_n = jnp.stack([c_cat[:b_in, :H], c_cat[:b_in, H:]], axis=0)
    return logp, (h_n, c_n)


# ----------------------- weight re-layout (done once, eagerly) ---------------------
def pack_params(p):
    """Re-lays out PyTorch-style weights into the kernel's interleaved gate layout.

    Interleaved columns: [i_f, i_b, f_f, f_b, o_f, o_b, g_f, g_b], each block H wide,
    so each gate for BOTH directions is one contiguous 2H (=128-lane) slice matching
    the (BP, 2H) [fwd | bwd] state layout. MXU operands are cast to bf16 here.
    """
    def gate_blocks(w):   # (X, 4H) in PyTorch [i, f, g, o] column order -> (i, f, o, g)
        return (w[:, 0:H], w[:, H:2 * H], w[:, 3 * H:4 * H], w[:, 2 * H:3 * H])

    def scatter(w4, direction, rows_total=None, row_offset=0):
        X = w4.shape[0]
        R = rows_total if rows_total is not None else X
        out = jnp.zeros((R, 8 * H), w4.dtype)
        for k, blk in enumerate(gate_blocks(w4)):
            c0 = (2 * k + direction) * H
            out = out.at[row_offset:row_offset + X, c0:c0 + H].set(blk)
        return out

    # Stacked input-projection weight: rows 0:E multiply x_t (forward direction),
    # rows E:2E multiply x_{T-1-t} (backward direction). Both biases folded into b_all.
    w_all = jnp.concatenate([scatter(p["wih_f"], 0), scatter(p["wih_b"], 1)], axis=0)  # (2E,8H)
    b_all = scatter(p["b_f"], 0) + scatter(p["b_b"], 1)                                # (1, 8H)

    whh = (scatter(p["whh_f"], 0, rows_total=2 * H, row_offset=0)
           + scatter(p["whh_b"], 1, rows_total=2 * H, row_offset=H))                   # (2H,8H)

    # Classifier over [h | h_step0] (4H): rows 0:H hit h_fwd_final, rows 3H:4H hit
    # h_bwd at original time T-1; middle 2H rows are unused -> zero. Lane-pad to C_PAD
    # with -1e30 bias so log-softmax max/sum are unchanged.
    wfc = p["wfc"]
    wfc_cat = jnp.concatenate([wfc[:H], jnp.zeros((2 * H, C), wfc.dtype), wfc[H:]], axis=0)
    wfc_pad = jnp.zeros((4 * H, C_PAD), wfc.dtype).at[:, :C].set(wfc_cat)
    bfc_pad = jnp.full((1, C_PAD), -1e30, jnp.float32).at[:, :C].set(p["bfc"])

    return {
        "embedding": p["embedding"],
        "w_all": w_all.astype(jnp.bfloat16),
        "b_all": b_all.astype(jnp.float32),
        "whh":   whh.astype(jnp.bfloat16),
        "wfc":   wfc_pad.astype(jnp.bfloat16),
        "bfc":   bfc_pad,
    }


# --------------------------- pure-JAX reference (for checking) --------------------
def lstm_reference(token_ids, hidden, params):
    h0, c0 = hidden
    emb = jnp.take(params["embedding"], token_ids, axis=0)   # (B, T, E)

    def cell(x_t, h, c, wih, whh, b):
        g = x_t @ wih + h @ whh + b
        i = jax.nn.sigmoid(g[:, 0 * H:1 * H])
        f = jax.nn.sigmoid(g[:, 1 * H:2 * H])
        gg = jnp.tanh(g[:, 2 * H:3 * H])
        o = jax.nn.sigmoid(g[:, 3 * H:4 * H])
        c = f * c + i * gg
        h = o * jnp.tanh(c)
        return h, c

    h, c = h0[0], c0[0]
    fwd_outs = []
    for t in range(T):
        h, c = cell(emb[:, t, :], h, c, params["wih_f"], params["whh_f"], params["b_f"])
        fwd_outs.append(h)
    h_fwd, c_fwd = h, c

    h, c = h0[1], c0[1]
    bwd_outs = [None] * T
    for t in range(T - 1, -1, -1):
        h, c = cell(emb[:, t, :], h, c, params["wih_b"], params["whh_b"], params["b_b"])
        bwd_outs[t] = h
    h_bwd, c_bwd = h, c

    last = jnp.concatenate([fwd_outs[-1], bwd_outs[-1]], axis=-1)    # (B, 2H)
    logits = last @ params["wfc"] + params["bfc"]
    logp = jax.nn.log_softmax(logits, axis=1)
    h_n = jnp.stack([h_fwd, h_bwd], axis=0)
    c_n = jnp.stack([c_fwd, c_bwd], axis=0)
    return logp, (h_n, c_n)


# ------------------------------- parameter init ------------------------------------
def init_params(key):
    k = 1.0 / np.sqrt(H)
    keys = jax.random.split(key, 12)
    u = lambda kk, shape, bound: jax.random.uniform(kk, shape, jnp.float32, -bound, bound)
    return {
        "embedding": jax.random.normal(keys[0], (V, E), jnp.float32),
        # forward direction (weight_ih_l0^T, weight_hh_l0^T, b_ih + b_hh), gate order [i,f,g,o]
        "wih_f": u(keys[1], (E, 4 * H), k),
        "whh_f": u(keys[2], (H, 4 * H), k),
        "b_f":   u(keys[3], (1, 4 * H), k) + u(keys[4], (1, 4 * H), k),
        # backward direction
        "wih_b": u(keys[5], (E, 4 * H), k),
        "whh_b": u(keys[6], (H, 4 * H), k),
        "b_b":   u(keys[7], (1, 4 * H), k) + u(keys[8], (1, 4 * H), k),
        # Linear(2H -> C)
        "wfc": u(keys[9], (2 * H, C), 1.0 / np.sqrt(2 * H)),
        "bfc": u(keys[10], (1, C), 1.0 / np.sqrt(2 * H)),
    }


if __name__ == "__main__":
    root = jax.random.PRNGKey(0)
    k_par, k_ids = jax.random.split(root)
    params = init_params(k_par)
    packed = pack_params(params)            # one-time weight re-layout (outside the hot path)

    token_ids = jax.random.randint(k_ids, (B, T), 0, V, dtype=jnp.int32)
    hidden = (jnp.zeros((2, B, H), jnp.float32), jnp.zeros((2, B, H), jnp.float32))

    logp, (h_n, c_n) = lstm_forward(token_ids, hidden, packed)
    jax.block_until_ready((logp, h_n, c_n))

    # correctness check vs. pure-JAX f32 reference (tolerance relaxed: bf16 MXU operands)
    logp_ref, (h_ref, c_ref) = lstm_reference(token_ids, hidden, params)
    np.testing.assert_allclose(np.asarray(logp), np.asarray(logp_ref), rtol=5e-2, atol=5e-2)
    np.testing.assert_allclose(np.asarray(h_n), np.asarray(h_ref), rtol=5e-2, atol=5e-2)
    np.testing.assert_allclose(np.asarray(c_n), np.asarray(c_ref), rtol=5e-2, atol=5e-2)

    print("KERNEL_OK")
</pallas_src>

<mosaic_0001>
module attributes {stable_mosaic.version = 11 : i64} {
  func.func @_bilstm_kernel(%arg0: memref<64x256xbf16, #tpu.memory_space<vmem>>, %arg1: memref<8x128xf32, #tpu.memory_space<vmem>>, %arg2: memref<8x128xf32, #tpu.memory_space<vmem>>, %arg3: memref<256x512xbf16, #tpu.memory_space<vmem>>, %arg4: memref<1x512xf32, #tpu.memory_space<vmem>>, %arg5: memref<128x512xbf16, #tpu.memory_space<vmem>>, %arg6: memref<256x128xbf16, #tpu.memory_space<vmem>>, %arg7: memref<1x128xf32, #tpu.memory_space<vmem>>, %arg8: memref<8x128xf32, #tpu.memory_space<vmem>>, %arg9: memref<8x128xf32, #tpu.memory_space<vmem>>, %arg10: memref<8x128xf32, #tpu.memory_space<vmem>>, %arg11: memref<64x512xf32, #tpu.memory_space<vmem>>) attributes {dimension_semantics = [], scalar_prefetch = 0 : i64, scratch_operands = 1 : i64, tpu.core_type = #tpu.core_type<tc>} {
    %c0 = arith.constant 0 : index
    %c0_0 = arith.constant 0 : index
    %0 = vector.load %arg0[%c0, %c0_0] : memref<64x256xbf16, #tpu.memory_space<vmem>>, vector<64x256xbf16>
    %c0_1 = arith.constant 0 : index
    %c0_2 = arith.constant 0 : index
    %1 = vector.load %arg3[%c0_1, %c0_2] : memref<256x512xbf16, #tpu.memory_space<vmem>>, vector<256x512xbf16>
    %cst = arith.constant dense<0.000000e+00> : vector<64x512xf32>
    %2 = tpu.matmul %0, %1, %cst {dimension_numbers = #tpu.dot_dimension_numbers<[1], [0], [0], [1], [0, 0, 1, 1], [], []>} : vector<64x256xbf16>, vector<256x512xbf16>, vector<64x512xf32> -> vector<64x512xf32>
    %c0_3 = arith.constant 0 : index
    %c0_4 = arith.constant 0 : index
    %3 = vector.load %arg4[%c0_3, %c0_4] : memref<1x512xf32, #tpu.memory_space<vmem>>, vector<1x512xf32>
    %4 = vector.broadcast %3 : vector<1x512xf32> to vector<64x512xf32>
    %5 = arith.addf %2, %4 : vector<64x512xf32>
    %c0_5 = arith.constant 0 : index
    %c0_6 = arith.constant 0 : index
    %6 = vector.load %arg11[%c0_5, %c0_6] : memref<64x512xf32, #tpu.memory_space<vmem>>, vector<64x512xf32>
    tpu.vector_store %arg11[%c0_5, %c0_6], %5 {strides = array<i32>} : memref<64x512xf32, #tpu.memory_space<vmem>>, vector<64x512xf32>,
    %c0_7 = arith.constant 0 : index
    %c0_8 = arith.constant 0 : index
    %7 = vector.load %arg5[%c0_7, %c0_8] : memref<128x512xbf16, #tpu.memory_space<vmem>>, vector<128x512xbf16>
    %c0_9 = arith.constant 0 : index
    %c0_10 = arith.constant 0 : index
    %8 = vector.load %arg1[%c0_9, %c0_10] : memref<8x128xf32, #tpu.memory_space<vmem>>, vector<8x128xf32>
    %c0_11 = arith.constant 0 : index
    %c0_12 = arith.constant 0 : index
    %9 = vector.load %arg2[%c0_11, %c0_12] : memref<8x128xf32, #tpu.memory_space<vmem>>, vector<8x128xf32>
    %c0_13 = arith.constant 0 : index
    %c0_14 = arith.constant 0 : index
    %10 = vector.load %arg11[%c0_13, %c0_14] : memref<64x512xf32, #tpu.memory_space<vmem>>, vector<8x512xf32>
    %11 = arith.truncf %8 : vector<8x128xf32> to vector<8x128xbf16>
    %cst_15 = arith.constant dense<0.000000e+00> : vector<8x512xf32>
    %12 = tpu.matmul %11, %7, %cst_15 {dimension_numbers = #tpu.dot_dimension_numbers<[1], [0], [0], [1], [0, 0, 1, 1], [], []>} : vector<8x128xbf16>, vector<128x512xbf16>, vector<8x512xf32> -> vector<8x512xf32>
    %13 = arith.addf %10, %12 : vector<8x512xf32>
    %14 = vector.extract_strided_slice %13 {offsets = [0, 0], sizes = [8, 384], strides = [1, 1]} : vector<8x512xf32> to vector<8x384xf32>
    %15 = arith.negf %14 : vector<8x384xf32>
    %16 = math.exp %15 : vector<8x384xf32>
    %cst_16 = arith.constant 1.000000e+00 : f32
    %17 = vector.broadcast %cst_16 : f32 to vector<8x384xf32>
    %18 = arith.addf %17, %16 : vector<8x384xf32>
    %19 = arith.divf %17, %18 : vector<8x384xf32>
    %20 = vector.extract_strided_slice %13 {offsets = [0, 384], sizes = [8, 128], strides = [1, 1]} : vector<8x512xf32> to vector<8x128xf32>
    %21 = math.tanh %20 : vector<8x128xf32>
    %22 = vector.extract_strided_slice %19 {offsets = [0, 0], sizes = [8, 128], strides = [1, 1]} : vector<8x384xf32> to vector<8x128xf32>
    %23 = vector.extract_strided_slice %19 {offsets = [0, 128], sizes = [8, 128], strides = [1, 1]} : vector<8x384xf32> to vector<8x128xf32>
    %24 = vector.extract_strided_slice %19 {offsets = [0, 256], sizes = [8, 128], strides = [1, 1]} : vector<8x384xf32> to vector<8x128xf32>
    %25 = arith.mulf %23, %9 : vector<8x128xf32>
    %26 = arith.mulf %22, %21 : vector<8x128xf32>
    %27 = arith.addf %25, %26 : vector<8x128xf32>
    %28 = math.tanh %27 : vector<8x128xf32>
    %29 = arith.mulf %24, %28 : vector<8x128xf32>
    %c8 = arith.constant 8 : index
    %c0_17 = arith.constant 0 : index
    %30 = vector.load %arg11[%c8, %c0_17] : memref<64x512xf32, #tpu.memory_space<vmem>>, vector<8x512xf32>
    %31 = arith.truncf %29 : vector<8x128xf32> to vector<8x128xbf16>
    %cst_18 = arith.constant dense<0.000000e+00> : vector<8x512xf32>
    %32 = tpu.matmul %31, %7, %cst_18 {dimension_numbers = #tpu.dot_dimension_numbers<[1], [0], [0], [1], [0, 0, 1, 1], [], []>} : vector<8x128xbf16>, vector<128x512xbf16>, vector<8x512xf32> -> vector<8x512xf32>
    %33 = arith.addf %30, %32 : vector<8x512xf32>
    %34 = vector.extract_strided_slice %33 {offsets = [0, 0], sizes = [8, 384], strides = [1, 1]} : vector<8x512xf32> to vector<8x384xf32>
    %35 = arith.negf %34 : vector<8x384xf32>
    %36 = math.exp %35 : vector<8x384xf32>
    %cst_19 = arith.constant 1.000000e+00 : f32
    %37 = vector.broadcast %cst_19 : f32 to vector<8x384xf32>
    %38 = arith.addf %37, %36 : vector<8x384xf32>
    %39 = arith.divf %37, %38 : vector<8x384xf32>
    %40 = vector.extract_strided_slice %33 {offsets = [0, 384], sizes = [8, 128], strides = [1, 1]} : vector<8x512xf32> to vector<8x128xf32>
    %41 = math.tanh %40 : vector<8x128xf32>
    %42 = vector.extract_strided_slice %39 {offsets = [0, 0], sizes = [8, 128], strides = [1, 1]} : vector<8x384xf32> to vector<8x128xf32>
    %43 = vector.extract_strided_slice %39 {offsets = [0, 128], sizes = [8, 128], strides = [1, 1]} : vector<8x384xf32> to vector<8x128xf32>
    %44 = vector.extract_strided_slice %39 {offsets = [0, 256], sizes = [8, 128], strides = [1, 1]} : vector<8x384xf32> to vector<8x128xf32>
    %45 = arith.mulf %43, %27 : vector<8x128xf32>
    %46 = arith.mulf %42, %41 : vector<8x128xf32>
    %47 = arith.addf %45, %46 : vector<8x128xf32>
    %48 = math.tanh %47 : vector<8x128xf32>
    %49 = arith.mulf %44, %48 : vector<8x128xf32>
    %c16 = arith.constant 16 : index
    %c0_20 = arith.constant 0 : index
    %50 = vector.load %arg11[%c16, %c0_20] : memref<64x512xf32, #tpu.memory_space<vmem>>, vector<8x512xf32>
    %51 = arith.truncf %49 : vector<8x128xf32> to vector<8x128xbf16>
    %cst_21 = arith.constant dense<0.000000e+00> : vector<8x512xf32>
    %52 = tpu.matmul %51, %7, %cst_21 {dimension_numbers = #tpu.dot_dimension_numbers<[1], [0], [0], [1], [0, 0, 1, 1], [], []>} : vector<8x128xbf16>, vector<128x512xbf16>, vector<8x512xf32> -> vector<8x512xf32>
    %53 = arith.addf %50, %52 : vector<8x512xf32>
    %54 = vector.extract_strided_slice %53 {offsets = [0, 0], sizes = [8, 384], strides = [1, 1]} : vector<8x512xf32> to vector<8x384xf32>
    %55 = arith.negf %54 : vector<8x384xf32>
    %56 = math.exp %55 : vector<8x384xf32>
    %cst_22 = arith.constant 1.000000e+00 : f32
    %57 = vector.broadcast %cst_22 : f32 to vector<8x384xf32>
    %58 = arith.addf %57, %56 : vector<8x384xf32>
    %59 = arith.divf %57, %58 : vector<8x384xf32>
    %60 = vector.extract_strided_slice %53 {offsets = [0, 384], sizes = [8, 128], strides = [1, 1]} : vector<8x512xf32> to vector<8x128xf32>
    %61 = math.tanh %60 : vector<8x128xf32>
    %62 = vector.extract_strided_slice %59 {offsets = [0, 0], sizes = [8, 128], strides = [1, 1]} : vector<8x384xf32> to vector<8x128xf32>
    %63 = vector.extract_strided_slice %59 {offsets = [0, 128], sizes = [8, 128], strides = [1, 1]} : vector<8x384xf32> to vector<8x128xf32>
    %64 = vector.extract_strided_slice %59 {offsets = [0, 256], sizes = [8, 128], strides = [1, 1]} : vector<8x384xf32> to vector<8x128xf32>
    %65 = arith.mulf %63, %47 : vector<8x128xf32>
    %66 = arith.mulf %62, %61 : vector<8x128xf32>
    %67 = arith.addf %65, %66 : vector<8x128xf32>
    %68 = math.tanh %67 : vector<8x128xf32>
    %69 = arith.mulf %64, %68 : vector<8x128xf32>
    %c24 = arith.constant 24 : index
    %c0_23 = arith.constant 0 : index
    %70 = vector.load %arg11[%c24, %c0_23] : memref<64x512xf32, #tpu.memory_space<vmem>>, vector<8x512xf32>
    %71 = arith.truncf %69 : vector<8x128xf32> to vector<8x128xbf16>
    %cst_24 = arith.constant dense<0.000000e+00> : vector<8x512xf32>
    %72 = tpu.matmul %71, %7, %cst_24 {dimension_numbers = #tpu.dot_dimension_numbers<[1], [0], [0], [1], [0, 0, 1, 1], [], []>} : vector<8x128xbf16>, vector<128x512xbf16>, vector<8x512xf32> -> vector<8x512xf32>
    %73 = arith.addf %70, %72 : vector<8x512xf32>
    %74 = vector.extract_strided_slice %73 {offsets = [0, 0], sizes = [8, 384], strides = [1, 1]} : vector<8x512xf32> to vector<8x384xf32>
    %75 = arith.negf %74 : vector<8x384xf32>
    %76 = math.exp %75 : vector<8x384xf32>
    %cst_25 = arith.constant 1.000000e+00 : f32
    %77 = vector.broadcast %cst_25 : f32 to vector<8x384xf32>
    %78 = arith.addf %77, %76 : vector<8x384xf32>
    %79 = arith.divf %77, %78 : vector<8x384xf32>
    %80 = vector.extract_strided_slice %73 {offsets = [0, 384], sizes = [8, 128], strides = [1, 1]} : vector<8x512xf32> to vector<8x128xf32>
    %81 = math.tanh %80 : vector<8x128xf32>
    %82 = vector.extract_strided_slice %79 {offsets = [0, 0], sizes = [8, 128], strides = [1, 1]} : vector<8x384xf32> to vector<8x128xf32>
    %83 = vector.extract_strided_slice %79 {offsets = [0, 128], sizes = [8, 128], strides = [1, 1]} : vector<8x384xf32> to vector<8x128xf32>
    %84 = vector.extract_strided_slice %79 {offsets = [0, 256], sizes = [8, 128], strides = [1, 1]} : vector<8x384xf32> to vector<8x128xf32>
    %85 = arith.mulf %83, %67 : vector<8x128xf32>
    %86 = arith.mulf %82, %81 : vector<8x128xf32>
    %87 = arith.addf %85, %86 : vector<8x128xf32>
    %88 = math.tanh %87 : vector<8x128xf32>
    %89 = arith.mulf %84, %88 : vector<8x128xf32>
    %c32 = arith.constant 32 : index
    %c0_26 = arith.constant 0 : index
    %90 = vector.load %arg11[%c32, %c0_26] : memref<64x512xf32, #tpu.memory_space<vmem>>, vector<8x512xf32>
    %91 = arith.truncf %89 : vector<8x128xf32> to vector<8x128xbf16>
    %cst_27 = arith.constant dense<0.000000e+00> : vector<8x512xf32>
    %92 = tpu.matmul %91, %7, %cst_27 {dimension_numbers = #tpu.dot_dimension_numbers<[1], [0], [0], [1], [0, 0, 1, 1], [], []>} : vector<8x128xbf16>, vector<128x512xbf16>, vector<8x512xf32> -> vector<8x512xf32>
    %93 = arith.addf %90, %92 : vector<8x512xf32>
    %94 = vector.extract_strided_slice %93 {offsets = [0, 0], sizes = [8, 384], strides = [1, 1]} : vector<8x512xf32> to vector<8x384xf32>
    %95 = arith.negf %94 : vector<8x384xf32>
    %96 = math.exp %95 : vector<8x384xf32>
    %cst_28 = arith.constant 1.000000e+00 : f32
    %97 = vector.broadcast %cst_28 : f32 to vector<8x384xf32>
    %98 = arith.addf %97, %96 : vector<8x384xf32>
    %99 = arith.divf %97, %98 : vector<8x384xf32>
    %100 = vector.extract_strided_slice %93 {offsets = [0, 384], sizes = [8, 128], strides = [1, 1]} : vector<8x512xf32> to vector<8x128xf32>
    %101 = math.tanh %100 : vector<8x128xf32>
    %102 = vector.extract_strided_slice %99 {offsets = [0, 0], sizes = [8, 128], strides = [1, 1]} : vector<8x384xf32> to vector<8x128xf32>
    %103 = vector.extract_strided_slice %99 {offsets = [0, 128], sizes = [8, 128], strides = [1, 1]} : vector<8x384xf32> to vector<8x128xf32>
    %104 = vector.extract_strided_slice %99 {offsets = [0, 256], sizes = [8, 128], strides = [1, 1]} : vector<8x384xf32> to vector<8x128xf32>
    %105 = arith.mulf %103, %87 : vector<8x128xf32>
    %106 = arith.mulf %102, %101 : vector<8x128xf32>
    %107 = arith.addf %105, %106 : vector<8x128xf32>
    %108 = math.tanh %107 : vector<8x128xf32>
    %109 = arith.mulf %104, %108 : vector<8x128xf32>
    %c40 = arith.constant 40 : index
    %c0_29 = arith.constant 0 : index
    %110 = vector.load %arg11[%c40, %c0_29] : memref<64x512xf32, #tpu.memory_space<vmem>>, vector<8x512xf32>
    %111 = arith.truncf %109 : vector<8x128xf32> to vector<8x128xbf16>
    %cst_30 = arith.constant dense<0.000000e+00> : vector<8x512xf32>
    %112 = tpu.matmul %111, %7, %cst_30 {dimension_numbers = #tpu.dot_dimension_numbers<[1], [0], [0], [1], [0, 0, 1, 1], [], []>} : vector<8x128xbf16>, vector<128x512xbf16>, vector<8x512xf32> -> vector<8x512xf32>
    %113 = arith.addf %110, %112 : vector<8x512xf32>
    %114 = vector.extract_strided_slice %113 {offsets = [0, 0], sizes = [8, 384], strides = [1, 1]} : vector<8x512xf32> to vector<8x384xf32>
    %115 = arith.negf %114 : vector<8x384xf32>
    %116 = math.exp %115 : vector<8x384xf32>
    %cst_31 = arith.constant 1.000000e+00 : f32
    %117 = vector.broadcast %cst_31 : f32 to vector<8x384xf32>
    %118 = arith.addf %117, %116 : vector<8x384xf32>
    %119 = arith.divf %117, %118 : vector<8x384xf32>
    %120 = vector.extract_strided_slice %113 {offsets = [0, 384], sizes = [8, 128], strides = [1, 1]} : vector<8x512xf32> to vector<8x128xf32>
    %121 = math.tanh %120 : vector<8x128xf32>
    %122 = vector.extract_strided_slice %119 {offsets = [0, 0], sizes = [8, 128], strides = [1, 1]} : vector<8x384xf32> to vector<8x128xf32>
    %123 = vector.extract_strided_slice %119 {offsets = [0, 128], sizes = [8, 128], strides = [1, 1]} : vector<8x384xf32> to vector<8x128xf32>
    %124 = vector.extract_strided_slice %119 {offsets = [0, 256], sizes = [8, 128], strides = [1, 1]} : vector<8x384xf32> to vector<8x128xf32>
    %125 = arith.mulf %123, %107 : vector<8x128xf32>
    %126 = arith.mulf %122, %121 : vector<8x128xf32>
    %127 = arith.addf %125, %126 : vector<8x128xf32>
    %128 = math.tanh %127 : vector<8x128xf32>
    %129 = arith.mulf %124, %128 : vector<8x128xf32>
    %c48 = arith.constant 48 : index
    %c0_32 = arith.constant 0 : index
    %130 = vector.load %arg11[%c48, %c0_32] : memref<64x512xf32, #tpu.memory_space<vmem>>, vector<8x512xf32>
    %131 = arith.truncf %129 : vector<8x128xf32> to vector<8x128xbf16>
    %cst_33 = arith.constant dense<0.000000e+00> : vector<8x512xf32>
    %132 = tpu.matmul %131, %7, %cst_33 {dimension_numbers = #tpu.dot_dimension_numbers<[1], [0], [0], [1], [0, 0, 1, 1], [], []>} : vector<8x128xbf16>, vector<128x512xbf16>, vector<8x512xf32> -> vector<8x512xf32>
    %133 = arith.addf %130, %132 : vector<8x512xf32>
    %134 = vector.extract_strided_slice %133 {offsets = [0, 0], sizes = [8, 384], strides = [1, 1]} : vector<8x512xf32> to vector<8x384xf32>
    %135 = arith.negf %134 : vector<8x384xf32>
    %136 = math.exp %135 : vector<8x384xf32>
    %cst_34 = arith.constant 1.000000e+00 : f32
    %137 = vector.broadcast %cst_34 : f32 to vector<8x384xf32>
    %138 = arith.addf %137, %136 : vector<8x384xf32>
    %139 = arith.divf %137, %138 : vector<8x384xf32>
    %140 = vector.extract_strided_slice %133 {offsets = [0, 384], sizes = [8, 128], strides = [1, 1]} : vector<8x512xf32> to vector<8x128xf32>
    %141 = math.tanh %140 : vector<8x128xf32>
    %142 = vector.extract_strided_slice %139 {offsets = [0, 0], sizes = [8, 128], strides = [1, 1]} : vector<8x384xf32> to vector<8x128xf32>
    %143 = vector.extract_strided_slice %139 {offsets = [0, 128], sizes = [8, 128], strides = [1, 1]} : vector<8x384xf32> to vector<8x128xf32>
    %144 = vector.extract_strided_slice %139 {offsets = [0, 256], sizes = [8, 128], strides = [1, 1]} : vector<8x384xf32> to vector<8x128xf32>
    %145 = arith.mulf %143, %127 : vector<8x128xf32>
    %146 = arith.mulf %142, %141 : vector<8x128xf32>
    %147 = arith.addf %145, %146 : vector<8x128xf32>
    %148 = math.tanh %147 : vector<8x128xf32>
    %149 = arith.mulf %144, %148 : vector<8x128xf32>
    %c56 = arith.constant 56 : index
    %c0_35 = arith.constant 0 : index
    %150 = vector.load %arg11[%c56, %c0_35] : memref<64x512xf32, #tpu.memory_space<vmem>>, vector<8x512xf32>
    %151 = arith.truncf %149 : vector<8x128xf32> to vector<8x128xbf16>
    %cst_36 = arith.constant dense<0.000000e+00> : vector<8x512xf32>
    %152 = tpu.matmul %151, %7, %cst_36 {dimension_numbers = #tpu.dot_dimension_numbers<[1], [0], [0], [1], [0, 0, 1, 1], [], []>} : vector<8x128xbf16>, vector<128x512xbf16>, vector<8x512xf32> -> vector<8x512xf32>
    %153 = arith.addf %150, %152 : vector<8x512xf32>
    %154 = vector.extract_strided_slice %153 {offsets = [0, 0], sizes = [8, 384], strides = [1, 1]} : vector<8x512xf32> to vector<8x384xf32>
    %155 = arith.negf %154 : vector<8x384xf32>
    %156 = math.exp %155 : vector<8x384xf32>
    %cst_37 = arith.constant 1.000000e+00 : f32
    %157 = vector.broadcast %cst_37 : f32 to vector<8x384xf32>
    %158 = arith.addf %157, %156 : vector<8x384xf32>
    %159 = arith.divf %157, %158 : vector<8x384xf32>
    %160 = vector.extract_strided_slice %153 {offsets = [0, 384], sizes = [8, 128], strides = [1, 1]} : vector<8x512xf32> to vector<8x128xf32>
    %161 = math.tanh %160 : vector<8x128xf32>
    %162 = vector.extract_strided_slice %159 {offsets = [0, 0], sizes = [8, 128], strides = [1, 1]} : vector<8x384xf32> to vector<8x128xf32>
    %163 = vector.extract_strided_slice %159 {offsets = [0, 128], sizes = [8, 128], strides = [1, 1]} : vector<8x384xf32> to vector<8x128xf32>
    %164 = vector.extract_strided_slice %159 {offsets = [0, 256], sizes = [8, 128], strides = [1, 1]} : vector<8x384xf32> to vector<8x128xf32>
    %165 = arith.mulf %163, %147 : vector<8x128xf32>
    %166 = arith.mulf %162, %161 : vector<8x128xf32>
    %167 = arith.addf %165, %166 : vector<8x128xf32>
    %168 = math.tanh %167 : vector<8x128xf32>
    %169 = arith.mulf %164, %168 : vector<8x128xf32>
    %170 = tpu.concatenate %169, %29 in 1 : vector<8x128xf32>, vector<8x128xf32> -> vector<8x256xf32>
    %171 = arith.truncf %170 : vector<8x256xf32> to vector<8x256xbf16>
    %c0_38 = arith.constant 0 : index
    %c0_39 = arith.constant 0 : index
    %172 = vector.load %arg6[%c0_38, %c0_39] : memref<256x128xbf16, #tpu.memory_space<vmem>>, vector<256x128xbf16>
    %cst_40 = arith.constant dense<0.000000e+00> : vector<8x128xf32>
    %173 = tpu.matmul %171, %172, %cst_40 {dimension_numbers = #tpu.dot_dimension_numbers<[1], [0], [0], [1], [0, 0, 1, 1], [], []>} : vector<8x256xbf16>, vector<256x128xbf16>, vector<8x128xf32> -> vector<8x128xf32>
    %c0_41 = arith.constant 0 : index
    %c0_42 = arith.constant 0 : index
    %174 = vector.load %arg7[%c0_41, %c0_42] : memref<1x128xf32, #tpu.memory_space<vmem>>, vector<1x128xf32>
    %175 = vector.broadcast %174 : vector<1x128xf32> to vector<8x128xf32>
    %176 = arith.addf %173, %175 : vector<8x128xf32>
    %cst_43 = arith.constant dense<0xFF800000> : vector<8xf32>
    %177 = vector.multi_reduction <maximumf>, %176, %cst_43 [1] : vector<8x128xf32> to vector<8xf32>
    %178 = vector.shape_cast %177 : vector<8xf32> to vector<8x1xf32>
    %179 = vector.broadcast %178 : vector<8x1xf32> to vector<8x128xf32>
    %180 = arith.subf %176, %179 : vector<8x128xf32>
    %181 = math.exp %180 : vector<8x128xf32>
    %cst_44 = arith.constant dense<0.000000e+00> : vector<8xf32>
    %182 = vector.multi_reduction <add>, %181, %cst_44 [1] : vector<8x128xf32> to vector<8xf32>
    %183 = vector.shape_cast %182 : vector<8xf32> to vector<8x1xf32>
    %184 = math.log %183 : vector<8x1xf32>
    %185 = vector.broadcast %184 : vector<8x1xf32> to vector<8x128xf32>
    %186 = arith.subf %180, %185 : vector<8x128xf32>
    %c0_45 = arith.constant 0 : index
    %c0_46 = arith.constant 0 : index
    %187 = vector.load %arg8[%c0_45, %c0_46] : memref<8x128xf32, #tpu.memory_space<vmem>>, vector<8x128xf32>
    tpu.vector_store %arg8[%c0_45, %c0_46], %186 {strides = array<i32>} : memref<8x128xf32, #tpu.memory_space<vmem>>, vector<8x128xf32>,
    %c0_47 = arith.constant 0 : index
    %c0_48 = arith.constant 0 : index
    %188 = vector.load %arg9[%c0_47, %c0_48] : memref<8x128xf32, #tpu.memory_space<vmem>>, vector<8x128xf32>
    tpu.vector_store %arg9[%c0_47, %c0_48], %169 {strides = array<i32>} : memref<8x128xf32, #tpu.memory_space<vmem>>, vector<8x128xf32>,
    %c0_49 = arith.constant 0 : index
    %c0_50 = arith.constant 0 : index
    %189 = vector.load %arg10[%c0_49, %c0_50] : memref<8x128xf32, #tpu.memory_space<vmem>>, vector<8x128xf32>
    tpu.vector_store %arg10[%c0_49, %c0_50], %167 {strides = array<i32>} : memref<8x128xf32, #tpu.memory_space<vmem>>, vector<8x128xf32>,
    return
  }
}

</mosaic_0001>

<bundles_post_ra>
// kernel: lstm_forward.1
= control target key start
LH: loop header
LB: loop body
LE: loop exit
PB: predicated region body
PF: predicated region fallthrough
CT: control target
= control target key end

     0   :  { %16 = vsyncpa [#allocation4], 0  ;;  %s4042_s0 = inlined_call_operand.vmem [shape: bf16[64,256], index: 0, kind: input, shape index: {}]   ;;  %s4043_s1 = inlined_call_operand.vmem [shape: f32[8,128], index: 1, kind: input, shape index: {}]   ;;  %s4044_s2 = inlined_call_operand.vmem [shape: f32[8,128], index: 2, kind: input, shape index: {}]   ;;  %s4045_s3 = inlined_call_operand.vmem [shape: bf16[256,512], index: 3, kind: input, shape index: {}]   ;;  %s4046_s4 = inlined_call_operand.vmem [shape: f32[1,512], index: 4, kind: input, shape index: {}]   ;;  %s4047_s5 = inlined_call_operand.hbm [shape: bf16[128,512], index: 5, kind: input, shape index: {}]   ;;  %s4048_s6 = inlined_call_operand.hbm [shape: bf16[256,128], index: 6, kind: input, shape index: {}]   ;;  %s4049_s7 = inlined_call_operand.vmem [shape: f32[1,128], index: 7, kind: input, shape index: {}]   ;;  %s4050_s8 = inlined_call_operand.vmem [shape: f32[8,128], index: 8, kind: output, shape index: {0}]   ;;  %s4051_s9 = inlined_call_operand.vmem [shape: f32[8,128], index: 9, kind: output, shape index: {1}]   ;;  %s4052_s10 = inlined_call_operand.vmem [shape: f32[8,128], index: 10, kind: output, shape index: {2}]  }
   0x1   :  { %s32_s15 = sshll.u32 %s4047_s5, 4  ;;  %s33_s15 = int_to_ptr.hbm [resolvable:$true] %s32_s15 }
   0x2   :  { %17 = vsyncpa [#allocation6], 0  ;;  %s2957_s16 = smov [#allocation3]   ;;  %s45_s20 = sshll.u32 %s4048_s6, 4  ;;  %s46_s20 = int_to_ptr.hbm [resolvable:$true] %s45_s20 }
   0x3   :  { %s34_s17 = sshll.u32 %s2957_s16, 4  ;;  %s2958_s21 = smov 256   ;;  %s35_s17 = int_to_ptr.vmem [resolvable:$true] %s34_s17 }
   0x4   :  { %s2959_s22 = smov 16   ;;  %s2960_s23 = smov [#allocation5]  }
   0x5   :  { %40 = dma.hbm_to_vmem [thread:$0]  %s33_s15, 4096, %s35_s17, [#allocation4], %s2958_s21, %s2958_s21, %s2959_s22  }
   0x6   :  { %s47_s24 = sshll.u32 %s2960_s23, 4  ;;  %s2961_s25 = smov 64   ;;  %s48_s24 = int_to_ptr.vmem [resolvable:$true] %s47_s24 }
   0x7   :  { %s2962_s26 = smov 4  }
   0x8   :  { %53 = dma.hbm_to_vmem [thread:$0]  %s46_s20, 2048, %s48_s24, [#allocation6], %s2961_s25, %s2961_s25, %s2962_s26  }
   0x9   :  { %2953 = dma.done.wait [#allocation4], 4096  }
   0xa   :  { %2954 = vsyncadd [#allocation4], 4294963200 }
   0xb   :  { %2955 = dma.done.wait [#allocation6], 2048  }
   0xc   :  { %2956 = vsyncadd [#allocation6], 4294965248  ;;  %v2288_v0 = vld [vmem:[%s4045_s3 + $0xe0] sm:$0xf]  ;;  %v2684_v1 = vld [vmem:[%s4045_s3 + $0xec] sm:$0xf0] }
   0xd   :  { %v2416_v2 = vld [vmem:[%s4045_s3 + $0x1e0] sm:$0xf]  ;;  %v2289_v3 = vor.u32 %v2684_v1, %v2288_v0  ;;  %v2716_v4 = vld [vmem:[%s4045_s3 + $0x1ec] sm:$0xf0]  ;;  %v2682_v5 = vld [vmem:[%s4045_s3 + $0xe4] sm:$0xf] }
   0xe   :  { %v2290_v6 = vld [vmem:[%s4045_s3 + $0xf0] sm:$0xf0]  ;;  %v2417_v7 = vor.u32 %v2716_v4, %v2416_v2  ;;  %v2714_v9 = vld [vmem:[%s4045_s3 + $0x1e4] sm:$0xf]  ;;  %v2272_v11 = vld [vmem:[%s4045_s3 + $0xc0] sm:$0xf] }
   0xf   :  { %v2293_v8 = vor.u32 %v2682_v5, %v2290_v6  ;;  %v2418_v10 = vld [vmem:[%s4045_s3 + $0x1f0] sm:$0xf0]  ;;  %506 = vmatpush.bf16.msra.mxu0 %v2289_v3  ;;  %v2680_v13 = vld [vmem:[%s4045_s3 + $0xcc] sm:$0xf0]  ;;  %v2400_v14 = vld [vmem:[%s4045_s3 + $0x1c0] sm:$0xf] }
  0x10   :  { %v2421_v12 = vor.u32 %v2714_v9, %v2418_v10  ;;  %v2712_v15 = vld [vmem:[%s4045_s3 + $0x1cc] sm:$0xf0]  ;;  %535 = vmatpush.bf16.msra.mxu1 %v2417_v7  ;;  %v2273_v16 = vor.u32 %v2680_v13, %v2272_v11  ;;  %v2678_v18 = vld [vmem:[%s4045_s3 + $0xc4] sm:$0xf]  ;;  %v2274_v19 = vld [vmem:[%s4045_s3 + $0xd0] sm:$0xf0] }
  0x11   :  { %564 = vmatpush.bf16.msra.mxu2 %v2293_v8  ;;  %v2401_v17 = vor.u32 %v2712_v15, %v2400_v14  ;;  %v2710_v20 = vld [vmem:[%s4045_s3 + $0x1c4] sm:$0xf]  ;;  %v2277_v21 = vor.u32 %v2678_v18, %v2274_v19  ;;  %v2402_v22 = vld [vmem:[%s4045_s3 + $0x1d0] sm:$0xf0]  ;;  %v2256_v23 = vld [vmem:[%s4045_s3 + $0xa0] sm:$0xf] }
  0x12   :  { %593 = vmatpush.bf16.msra.mxu3 %v2421_v12  ;;  %v2676_v24 = vld [vmem:[%s4045_s3 + $0xac] sm:$0xf0]  ;;  %v2405_v25 = vor.u32 %v2710_v20, %v2402_v22  ;;  %v2384_v26 = vld [vmem:[%s4045_s3 + $0x1a0] sm:$0xf]  ;;  %v2674_v28 = vld [vmem:[%s4045_s3 + $0xa4] sm:$0xf] }
  0x13   :  { %v2708_v27 = vld [vmem:[%s4045_s3 + $0x1ac] sm:$0xf0]  ;;  %507 = vmatpush.bf16.msra.mxu0 %v2273_v16  ;;  %v2257_v29 = vor.u32 %v2676_v24, %v2256_v23  ;;  %v2258_v30 = vld [vmem:[%s4045_s3 + $0xb0] sm:$0xf0]  ;;  %v2706_v31 = vld [vmem:[%s4045_s3 + $0x1a4] sm:$0xf] }
  0x14   :  { %v2386_v32 = vld [vmem:[%s4045_s3 + $0x1b0] sm:$0xf0]  ;;  %536 = vmatpush.bf16.msra.mxu1 %v2401_v17  ;;  %v2385_v33 = vor.u32 %v2708_v27, %v2384_v26  ;;  %v2261_v34 = vor.u32 %v2674_v28, %v2258_v30  ;;  %v2240_v35 = vld [vmem:[%s4045_s3 + $0x80] sm:$0xf]  ;;  %v2672_v36 = vld [vmem:[%s4045_s3 + $0x8c] sm:$0xf0] }
  0x15   :  { %565 = vmatpush.bf16.msra.mxu2 %v2277_v21  ;;  %v2368_v37 = vld [vmem:[%s4045_s3 + $0x180] sm:$0xf]  ;;  %v2389_v38 = vor.u32 %v2706_v31, %v2386_v32  ;;  %v2704_v39 = vld [vmem:[%s4045_s3 + $0x18c] sm:$0xf0]  ;;  %v2670_v40 = vld [vmem:[%s4045_s3 + $0x84] sm:$0xf]  ;;  %v2241_v44 = vor.u32 %v2672_v36, %v2240_v35 }
  0x16   :  { %594 = vmatpush.bf16.msra.mxu3 %v2405_v25  ;;  %v2242_v41 = vld [vmem:[%s4045_s3 + $0x90] sm:$0xf0]  ;;  %v2702_v42 = vld [vmem:[%s4045_s3 + $0x184] sm:$0xf]  ;;  %v2369_v45 = vor.u32 %v2704_v39, %v2368_v37  ;;  %v2224_v47 = vld [vmem:[%s4045_s3 + $0x60] sm:$0xf] }
  0x17   :  { %v2370_v43 = vld [vmem:[%s4045_s3 + $0x190] sm:$0xf0]  ;;  %508 = vmatpush.bf16.msra.mxu0 %v2257_v29  ;;  %v2245_v46 = vor.u32 %v2670_v40, %v2242_v41  ;;  %v2668_v48 = vld [vmem:[%s4045_s3 + $0x6c] sm:$0xf0]  ;;  %v2352_v49 = vld [vmem:[%s4045_s3 + $0x160] sm:$0xf] }
  0x18   :  { %537 = vmatpush.bf16.msra.mxu1 %v2385_v33  ;;  %v2373_v50 = vor.u32 %v2702_v42, %v2370_v43  ;;  %v2700_v51 = vld [vmem:[%s4045_s3 + $0x16c] sm:$0xf0]  ;;  %v2666_v52 = vld [vmem:[%s4045_s3 + $0x64] sm:$0xf]  ;;  %v2226_v53 = vld [vmem:[%s4045_s3 + $0x70] sm:$0xf0]  ;;  %v2225_v56 = vor.u32 %v2668_v48, %v2224_v47 }
  0x19   :  { %566 = vmatpush.bf16.msra.mxu2 %v2261_v34  ;;  %v2698_v54 = vld [vmem:[%s4045_s3 + $0x164] sm:$0xf]  ;;  %v2354_v55 = vld [vmem:[%s4045_s3 + $0x170] sm:$0xf0]  ;;  %v2353_v57 = vor.u32 %v2700_v51, %v2352_v49  ;;  %v2229_v58 = vor.u32 %v2666_v52, %v2226_v53  ;;  %v2208_v59 = vld [vmem:[%s4045_s3 + $0x40] sm:$0xf] }
  0x1a   :  { %595 = vmatpush.bf16.msra.mxu3 %v2389_v38  ;;  %v2664_v60 = vld [vmem:[%s4045_s3 + $0x4c] sm:$0xf0]  ;;  %v2336_v61 = vld [vmem:[%s4045_s3 + $0x140] sm:$0xf]  ;;  %v2357_v62 = vor.u32 %v2698_v54, %v2354_v55  ;;  %v2662_v0 = vld [vmem:[%s4045_s3 + $0x44] sm:$0xf] }
  0x1b   :  { %509 = vmatpush.bf16.msra.mxu0 %v2241_v44  ;;  %v2696_v63 = vld [vmem:[%s4045_s3 + $0x14c] sm:$0xf0]  ;;  %v2210_v1 = vld [vmem:[%s4045_s3 + $0x50] sm:$0xf0]  ;;  %v2694_v2 = vld [vmem:[%s4045_s3 + $0x144] sm:$0xf]  ;;  %v2209_v4 = vor.u32 %v2664_v60, %v2208_v59 }
  0x1c   :  { %538 = vmatpush.bf16.msra.mxu1 %v2369_v45  ;;  %v2338_v3 = vld [vmem:[%s4045_s3 + $0x150] sm:$0xf0]  ;;  %v2337_v5 = vor.u32 %v2696_v63, %v2336_v61  ;;  %v2213_v6 = vor.u32 %v2662_v0, %v2210_v1  ;;  %v2192_v7 = vld [vmem:[%s4045_s3 + $0x20] sm:$0xf]  ;;  %v2660_v8 = vld [vmem:[%s4045_s3 + $0x2c] sm:$0xf0] }
  0x1d   :  { %567 = vmatpush.bf16.msra.mxu2 %v2245_v46  ;;  %v2320_v9 = vld [vmem:[%s4045_s3 + $0x120] sm:$0xf]  ;;  %v2341_v10 = vor.u32 %v2694_v2, %v2338_v3  ;;  %v2692_v11 = vld [vmem:[%s4045_s3 + $0x12c] sm:$0xf0]  ;;  %v2658_v12 = vld [vmem:[%s4045_s3 + $0x24] sm:$0xf]  ;;  %v2193_v16 = vor.u32 %v2660_v8, %v2192_v7 }
  0x1e   :  { %596 = vmatpush.bf16.msra.mxu3 %v2373_v50  ;;  %v2194_v13 = vld [vmem:[%s4045_s3 + $0x30] sm:$0xf0]  ;;  %v2690_v14 = vld [vmem:[%s4045_s3 + $0x124] sm:$0xf]  ;;  %v2176_v17 = vld [vmem:[%s4045_s3] sm:$0xf]  ;;  %v2321_v19 = vor.u32 %v2692_v11, %v2320_v9 }
  0x1f   :  { %510 = vmatpush.bf16.msra.mxu0 %v2225_v56  ;;  %v2322_v15 = vld [vmem:[%s4045_s3 + $0x130] sm:$0xf0]  ;;  %v2656_v18 = vld [vmem:[%s4045_s3 + $0xc] sm:$0xf0]  ;;  %v2197_v20 = vor.u32 %v2658_v12, %v2194_v13  ;;  %v2304_v21 = vld [vmem:[%s4045_s3 + $0x100] sm:$0xf] }
  0x20   :  { %539 = vmatpush.bf16.msra.mxu1 %v2353_v57  ;;  %v2688_v22 = vld [vmem:[%s4045_s3 + $0x10c] sm:$0xf0]  ;;  %v2654_v23 = vld [vmem:[%s4045_s3 + $0x4] sm:$0xf]  ;;  %v2325_v24 = vor.u32 %v2690_v14, %v2322_v15  ;;  %v2178_v25 = vld [vmem:[%s4045_s3 + $0x10] sm:$0xf0]  ;;  %v2177_v31 = vor.u32 %v2656_v18, %v2176_v17 }
  0x21   :  { %568 = vmatpush.bf16.msra.mxu2 %v2229_v58  ;;  %v2686_v26 = vld [vmem:[%s4045_s3 + $0x104] sm:$0xf]  ;;  %v2306_v27 = vld [vmem:[%s4045_s3 + $0x110] sm:$0xf0]  ;;  %v2144_v28 = vld [vmem:[%s4042_s0] sm:$0xf]  ;;  %v2305_v35 = vor.u32 %v2688_v22, %v2304_v21  ;;  %v2181_v36 = vor.u32 %v2654_v23, %v2178_v25 }
  0x22   :  { %597 = vmatpush.bf16.msra.mxu3 %v2357_v62  ;;  %v2296_v29 = vld [vmem:[%s4045_s3 + $0xe8] sm:$0xf]  ;;  %v2685_v30 = vld [vmem:[%s4045_s3 + $0xf4] sm:$0xf0]  ;;  %v2646_v37 = vld [vmem:[%s4042_s0 + $0x4] sm:$0xf]  ;;  %v2309_v39 = vor.u32 %v2686_v26, %v2306_v27 }
  0x23   :  { %511 = vmatpush.bf16.msra.mxu0 %v2209_v4  ;;  %v2647_v32 = vld [vmem:[%s4042_s0 + $0x4] sm:$0xf0]  ;;  %v2717_v34 = vld [vmem:[%s4045_s3 + $0x1f4] sm:$0xf0]  ;;  %v2146_v38 = vld [vmem:[%s4042_s0 + $0x8] sm:$0xf0]  ;;  %v2297_v40 = vor.u32 %v2685_v30, %v2296_v29 }
  0x24   :  { %540 = vmatpush.bf16.msra.mxu1 %v2337_v5  ;;  %v2424_v33 = vld [vmem:[%s4045_s3 + $0x1e8] sm:$0xf]  ;;  %v2683_v41 = vld [vmem:[%s4045_s3 + $0xec] sm:$0xf]  ;;  %v2298_v42 = vld [vmem:[%s4045_s3 + $0xf8] sm:$0xf0]  ;;  %v3249_v44 = vor.u32 %v2647_v32, %v2144_v28  ;;  %v3260_v49 = vor.u32 %v2646_v37, %v2146_v38 }
  0x25   :  { %569 = vmatpush.bf16.msra.mxu2 %v2213_v6  ;;  %v2280_v43 = vld [vmem:[%s4045_s3 + $0xc8] sm:$0xf]  ;;  %v2425_v45 = vor.u32 %v2717_v34, %v2424_v33  ;;  %v2681_v46 = vld [vmem:[%s4045_s3 + $0xd4] sm:$0xf0]  ;;  %v2715_v47 = vld [vmem:[%s4045_s3 + $0x1ec] sm:$0xf]  ;;  %v2301_v52 = vor.u32 %v2683_v41, %v2298_v42 }
  0x26   :  { %598 = vmatpush.bf16.msra.mxu3 %v2341_v10  ;;  %v2426_v48 = vld [vmem:[%s4045_s3 + $0x1f8] sm:$0xf0]  ;;  %v2408_v50 = vld [vmem:[%s4045_s3 + $0x1c8] sm:$0xf]  ;;  %v2713_v51 = vld [vmem:[%s4045_s3 + $0x1d4] sm:$0xf0]  ;;  %v2281_v53 = vor.u32 %v2681_v46, %v2280_v43 }
  0x27   :  { %512 = vmatpush.bf16.msra.mxu0 %v2193_v16  ;;  %v2679_v54 = vld [vmem:[%s4045_s3 + $0xcc] sm:$0xf]  ;;  %v2282_v55 = vld [vmem:[%s4045_s3 + $0xd8] sm:$0xf0]  ;;  %v2429_v56 = vor.u32 %v2715_v47, %v2426_v48  ;;  %v2264_v57 = vld [vmem:[%s4045_s3 + $0xa8] sm:$0xf]  ;;  %v2409_v58 = vor.u32 %v2713_v51, %v2408_v50 }
  0x28   :  { %541 = vmatpush.bf16.msra.mxu1 %v2321_v19  ;;  %v2677_v59 = vld [vmem:[%s4045_s3 + $0xb4] sm:$0xf0]  ;;  %v2711_v60 = vld [vmem:[%s4045_s3 + $0x1cc] sm:$0xf]  ;;  %v2410_v61 = vld [vmem:[%s4045_s3 + $0x1d8] sm:$0xf0]  ;;  %v2285_v0 = vor.u32 %v2679_v54, %v2282_v55 }
  0x29   :  { %570 = vmatpush.bf16.msra.mxu2 %v2197_v20  ;;  %v2392_v62 = vld [vmem:[%s4045_s3 + $0x1a8] sm:$0xf]  ;;  %v2709_v63 = vld [vmem:[%s4045_s3 + $0x1b4] sm:$0xf0]  ;;  %v2265_v1 = vor.u32 %v2677_v59, %v2264_v57  ;;  %v2675_v2 = vld [vmem:[%s4045_s3 + $0xac] sm:$0xf]  ;;  %v2413_v4 = vor.u32 %v2711_v60, %v2410_v61 }
  0x2a   :  { %599 = vmatpush.bf16.msra.mxu3 %v2325_v24  ;;  %v2266_v3 = vld [vmem:[%s4045_s3 + $0xb8] sm:$0xf0]  ;;  %v2248_v5 = vld [vmem:[%s4045_s3 + $0x88] sm:$0xf]  ;;  %v2393_v6 = vor.u32 %v2709_v63, %v2392_v62  ;;  %v2673_v7 = vld [vmem:[%s4045_s3 + $0x94] sm:$0xf0] }
  0x2b   :  { %513 = vmatpush.bf16.msra.mxu0 %v2177_v31  ;;  %v2707_v8 = vld [vmem:[%s4045_s3 + $0x1ac] sm:$0xf]  ;;  %v2394_v9 = vld [vmem:[%s4045_s3 + $0x1b8] sm:$0xf0]  ;;  %v2376_v10 = vld [vmem:[%s4045_s3 + $0x188] sm:$0xf]  ;;  %v2269_v12 = vor.u32 %v2675_v2, %v2266_v3  ;;  %v2249_v14 = vor.u32 %v2673_v7, %v2248_v5 }
  0x2c   :  { %542 = vmatpush.bf16.msra.mxu1 %v2305_v35  ;;  %v2705_v11 = vld [vmem:[%s4045_s3 + $0x194] sm:$0xf0]  ;;  %v2152_v13 = vld [vmem:[%s4042_s0 + $0x10] sm:$0xf]  ;;  %v2671_v15 = vld [vmem:[%s4045_s3 + $0x8c] sm:$0xf]  ;;  %v2397_v17 = vor.u32 %v2707_v8, %v2394_v9 }
  0x2d   :  { %571 = vmatpush.bf16.msra.mxu2 %v2181_v36  ;;  %v2250_v16 = vld [vmem:[%s4045_s3 + $0x98] sm:$0xf0]  ;;  %v2232_v18 = vld [vmem:[%s4045_s3 + $0x68] sm:$0xf]  ;;  %v2377_v19 = vor.u32 %v2705_v11, %v2376_v10  ;;  %v2669_v20 = vld [vmem:[%s4045_s3 + $0x74] sm:$0xf0] }
  0x2e   :  { %600 = vmatpush.bf16.msra.mxu3 %v2309_v39  ;;  %514 = vmatmul.bf16.vlgmr.msra.gmra.mxu0 %v3249_v44  ;;  %v2703_v21 = vld [vmem:[%s4045_s3 + $0x18c] sm:$0xf]  ;;  %v2378_v22 = vld [vmem:[%s4045_s3 + $0x198] sm:$0xf0]  ;;  %v2649_v23 = vld [vmem:[%s4042_s0 + $0x14] sm:$0xf0]  ;;  %v2253_v28 = vor.u32 %v2671_v15, %v2250_v16  ;;  %v2233_v29 = vor.u32 %v2669_v20, %v2232_v18 }
  0x2f   :  { %622 = vmatpush.bf16.msrb.mxu0 %v2297_v40  ;;  %543 = vmatmul.bf16.vlgmr.msra.gmra.mxu1 %v3260_v49  ;;  %v2360_v24 = vld [vmem:[%s4045_s3 + $0x168] sm:$0xf]  ;;  %v2701_v25 = vld [vmem:[%s4045_s3 + $0x174] sm:$0xf0]  ;;  %v2648_v26 = vld [vmem:[%s4042_s0 + $0x14] sm:$0xf]  ;;  %v2381_v32 = vor.u32 %v2703_v21, %v2378_v22  ;;  %v3365_v34 = vor.u32 %v2649_v23, %v2152_v13 }
  0x30   :  { %651 = vmatpush.bf16.msrb.mxu1 %v2425_v45  ;;  %572 = vmatmul.bf16.vlgmr.msra.gmra.mxu2 %v3249_v44  ;;  %v2154_v27 = vld [vmem:[%s4042_s0 + $0x18] sm:$0xf0]  ;;  %v2667_v30 = vld [vmem:[%s4045_s3 + $0x6c] sm:$0xf]  ;;  %v2216_v33 = vld [vmem:[%s4045_s3 + $0x48] sm:$0xf]  ;;  %v2361_v35 = vor.u32 %v2701_v25, %v2360_v24 }
  0x31   :  { %601 = vmatmul.bf16.vlgmr.msra.gmra.mxu3 %v3260_v49  ;;  %680 = vmatpush.bf16.msrb.mxu2 %v2301_v52  ;;  %v2234_v31 = vld [vmem:[%s4045_s3 + $0x78] sm:$0xf0]  ;;  %v2665_v36 = vld [vmem:[%s4045_s3 + $0x54] sm:$0xf0]  ;;  %v2699_v37 = vld [vmem:[%s4045_s3 + $0x16c] sm:$0xf]  ;;  %v3376_v39 = vor.u32 %v2648_v26, %v2154_v27 }
  0x32   :  { %709 = vmatpush.bf16.msrb.mxu3 %v2429_v56  ;;  %v2362_v38 = vld [vmem:[%s4045_s3 + $0x178] sm:$0xf0]  ;;  %v2344_v40 = vld [vmem:[%s4045_s3 + $0x148] sm:$0xf]  ;;  %v2697_v41 = vld [vmem:[%s4045_s3 + $0x154] sm:$0xf0]  ;;  %v2237_v42 = vor.u32 %v2667_v30, %v2234_v31  ;;  %v2217_v43 = vor.u32 %v2665_v36, %v2216_v33 }
  0x33   :  { %623 = vmatpush.bf16.msrb.mxu0 %v2281_v53  ;;  %v2663_v45 = vld [vmem:[%s4045_s3 + $0x4c] sm:$0xf]  ;;  %v2218_v46 = vld [vmem:[%s4045_s3 + $0x58] sm:$0xf0]  ;;  %v2365_v47 = vor.u32 %v2699_v37, %v2362_v38  ;;  %v2345_v48 = vor.u32 %v2697_v41, %v2344_v40  ;;  %v2200_v51 = vld [vmem:[%s4045_s3 + $0x28] sm:$0xf] }
  0x34   :  { %652 = vmatpush.bf16.msrb.mxu1 %v2409_v58  ;;  %v2221_v50 = vor.u32 %v2663_v45, %v2218_v46  ;;  %v2661_v52 = vld [vmem:[%s4045_s3 + $0x34] sm:$0xf0]  ;;  %v2328_v53 = vld [vmem:[%s4045_s3 + $0x128] sm:$0xf]  ;;  %v2659_v56 = vld [vmem:[%s4045_s3 + $0x2c] sm:$0xf] }
  0x35   :  { %681 = vmatpush.bf16.msrb.mxu2 %v2285_v0  ;;  %v2201_v54 = vor.u32 %v2661_v52, %v2200_v51  ;;  %v2693_v55 = vld [vmem:[%s4045_s3 + $0x134] sm:$0xf0]  ;;  %v2202_v57 = vld [vmem:[%s4045_s3 + $0x38] sm:$0xf0]  ;;  %v2695_v59 = vld [vmem:[%s4045_s3 + $0x14c] sm:$0xf] }
  0x36   :  { %710 = vmatpush.bf16.msrb.mxu3 %v2413_v4  ;;  %v2329_v58 = vor.u32 %v2693_v55, %v2328_v53  ;;  %v2346_v60 = vld [vmem:[%s4045_s3 + $0x158] sm:$0xf0]  ;;  %v2184_v61 = vld [vmem:[%s4045_s3 + $0x8] sm:$0xf]  ;;  %v2657_v63 = vld [vmem:[%s4045_s3 + $0x14] sm:$0xf0]  ;;  %v2205_v2 = vor.u32 %v2659_v56, %v2202_v57 }
  0x37   :  { %624 = vmatpush.bf16.msrb.mxu0 %v2265_v1  ;;  %v2349_v62 = vor.u32 %v2695_v59, %v2346_v60  ;;  %v2312_v0 = vld [vmem:[%s4045_s3 + $0x108] sm:$0xf]  ;;  %v2689_v1 = vld [vmem:[%s4045_s3 + $0x114] sm:$0xf0]  ;;  %v2691_v3 = vld [vmem:[%s4045_s3 + $0x12c] sm:$0xf]  ;;  %v2185_v5 = vor.u32 %v2657_v63, %v2184_v61 }
  0x38   :  { %653 = vmatpush.bf16.msrb.mxu1 %v2393_v6  ;;  %v2330_v4 = vld [vmem:[%s4045_s3 + $0x138] sm:$0xf0]  ;;  %v2655_v7 = vld [vmem:[%s4045_s3 + $0xc] sm:$0xf]  ;;  %v2313_v9 = vor.u32 %v2689_v1, %v2312_v0  ;;  %v2651_v13 = vld [vmem:[%s4042_s0 + $0x24] sm:$0xf0] }
  0x39   :  { %682 = vmatpush.bf16.msrb.mxu2 %v2269_v12  ;;  %v2333_v6 = vor.u32 %v2691_v3, %v2330_v4  ;;  %v2186_v8 = vld [vmem:[%s4045_s3 + $0x18] sm:$0xf0]  ;;  %v2687_v10 = vld [vmem:[%s4045_s3 + $0x10c] sm:$0xf]  ;;  %v2160_v12 = vld [vmem:[%s4042_s0 + $0x20] sm:$0xf] }
  0x3a   :  { %711 = vmatpush.bf16.msrb.mxu3 %v2397_v17  ;;  %v2314_v11 = vld [vmem:[%s4045_s3 + $0x118] sm:$0xf0]  ;;  %v2162_v15 = vld [vmem:[%s4042_s0 + $0x28] sm:$0xf0]  ;;  %v2189_v16 = vor.u32 %v2655_v7, %v2186_v8  ;;  %v3460_v18 = vor.u32 %v2651_v13, %v2160_v12  ;;  %v2544_v20 = vld [vmem:[#allocation3 + $0xe0] sm:$0xf] }
  0x3b   :  { %625 = vmatpush.bf16.msrb.mxu0 %v2249_v14  ;;  %v2650_v14 = vld [vmem:[%s4042_s0 + $0x24] sm:$0xf]  ;;  %v2317_v17 = vor.u32 %v2687_v10, %v2314_v11  ;;  %v2748_v21 = vld [vmem:[#allocation3 + $0xec] sm:$0xf0]  ;;  %v2546_v24 = vld [vmem:[#allocation3 + $0xf0] sm:$0xf0] }
  0x3c   :  { %654 = vmatpush.bf16.msrb.mxu1 %v2377_v19  ;;  %v3462_v19 = vor.u32 %v2650_v14, %v2162_v15  ;;  %v2746_v22 = vld [vmem:[#allocation3 + $0xe4] sm:$0xf]  ;;  %v3468_v23 = vor.u32 %v2748_v21, %v2544_v20  ;;  %v2552_v25 = vld [vmem:[#allocation3 + $0xe8] sm:$0xf]  ;;  %v2749_v26 = vld [vmem:[#allocation3 + $0xf4] sm:$0xf0] }
  0x3d   :  { %683 = vmatpush.bf16.msrb.mxu2 %v2253_v28  ;;  %v3470_v27 = vor.u32 %v2746_v22, %v2546_v24  ;;  %v3472_v28 = vor.u32 %v2749_v26, %v2552_v25  ;;  %v2744_v30 = vld [vmem:[#allocation3 + $0xcc] sm:$0xf0]  ;;  %v2742_v31 = vld [vmem:[#allocation3 + $0xc4] sm:$0xf]  ;;  %v2530_v33 = vld [vmem:[#allocation3 + $0xd0] sm:$0xf0] }
  0x3e   :  { %712 = vmatpush.bf16.msrb.mxu3 %v2381_v32  ;;  %519 = vmatmul.bf16.gmra.mxu0 %v3365_v34  ;;  %v2745_v36 = vld [vmem:[#allocation3 + $0xd4] sm:$0xf0]  ;;  %v3479_v37 = vor.u32 %v2742_v31, %v2530_v33  ;;  %v2747_v40 = vld [vmem:[#allocation3 + $0xec] sm:$0xf]  ;;  %v2554_v41 = vld [vmem:[#allocation3 + $0xf8] sm:$0xf0] }
  0x3f   :  { %626 = vmatpush.bf16.msrb.mxu0 %v2233_v29  ;;  %548 = vmatmul.bf16.gmra.mxu1 %v3376_v39  ;;  %v2528_v29 = vld [vmem:[#allocation3 + $0xc0] sm:$0xf]  ;;  %v2653_v45 = vld [vmem:[%s4042_s0 + $0x34] sm:$0xf0]  ;;  %v2652_v46 = vld [vmem:[%s4042_s0 + $0x34] sm:$0xf] }
  0x40   :  { %655 = vmatpush.bf16.msrb.mxu1 %v2361_v35  ;;  %577 = vmatmul.bf16.gmra.mxu2 %v3365_v34  ;;  %v3475_v32 = vor.u32 %v2744_v30, %v2528_v29  ;;  %v2536_v35 = vld [vmem:[#allocation3 + $0xc8] sm:$0xf]  ;;  %v2512_v51 = vld [vmem:[#allocation3 + $0xa0] sm:$0xf]  ;;  %v2740_v52 = vld [vmem:[#allocation3 + $0xac] sm:$0xf0] }
  0x41   :  { %606 = vmatmul.bf16.gmra.mxu3 %v3376_v39  ;;  %684 = vmatpush.bf16.msrb.mxu2 %v2237_v42  ;;  %v3481_v38 = vor.u32 %v2745_v36, %v2536_v35  ;;  %v3483_v42 = vor.u32 %v2747_v40, %v2554_v41  ;;  %v2738_v53 = vld [vmem:[#allocation3 + $0xa4] sm:$0xf]  ;;  %v2514_v55 = vld [vmem:[#allocation3 + $0xb0] sm:$0xf0]  ;;  %v2520_v56 = vld [vmem:[#allocation3 + $0xa8] sm:$0xf] }
  0x42   :  { %713 = vmatpush.bf16.msrb.mxu3 %v2365_v47  ;;  %v2170_v47 = vld [vmem:[%s4042_s0 + $0x38] sm:$0xf0]  ;;  %v2741_v57 = vld [vmem:[#allocation3 + $0xb4] sm:$0xf0]  ;;  %v2743_v60 = vld [vmem:[#allocation3 + $0xcc] sm:$0xf] }
  0x43   :  { %627 = vmatpush.bf16.msrb.mxu0 %v2217_v43  ;;  %v2168_v43 = vld [vmem:[%s4042_s0 + $0x30] sm:$0xf]  ;;  %v3513_v59 = vor.u32 %v2741_v57, %v2520_v56  ;;  %v2538_v61 = vld [vmem:[#allocation3 + $0xd8] sm:$0xf0]  ;;  %v2734_v1 = vld [vmem:[#allocation3 + $0x84] sm:$0xf] }
  0x44   :  { %656 = vmatpush.bf16.msrb.mxu1 %v2345_v48  ;;  %v3501_v48 = vor.u32 %v2653_v45, %v2168_v43  ;;  %v3516_v63 = vor.u32 %v2743_v60, %v2538_v61  ;;  %v2736_v0 = vld [vmem:[#allocation3 + $0x8c] sm:$0xf0]  ;;  %v2739_v7 = vld [vmem:[#allocation3 + $0xac] sm:$0xf]  ;;  %v2480_v11 = vld [vmem:[#allocation3 + $0x60] sm:$0xf] }
  0x45   :  { %685 = vmatpush.bf16.msrb.mxu2 %v2221_v50  ;;  %v3503_v50 = vor.u32 %v2652_v46, %v2170_v47  ;;  %v2732_v12 = vld [vmem:[#allocation3 + $0x6c] sm:$0xf0]  ;;  %v2730_v13 = vld [vmem:[#allocation3 + $0x64] sm:$0xf]  ;;  %v2482_v15 = vld [vmem:[#allocation3 + $0x70] sm:$0xf0] }
  0x46   :  { %714 = vmatpush.bf16.msrb.mxu3 %v2349_v62  ;;  %v2496_v62 = vld [vmem:[#allocation3 + $0x80] sm:$0xf]  ;;  %v3537_v14 = vor.u32 %v2732_v12, %v2480_v11  ;;  %v3539_v20 = vor.u32 %v2730_v13, %v2482_v15  ;;  %v2735_v22 = vld [vmem:[#allocation3 + $0x8c] sm:$0xf]  ;;  %v2506_v24 = vld [vmem:[#allocation3 + $0x98] sm:$0xf0] }
  0x47   :  { %628 = vmatpush.bf16.msrb.mxu0 %v2201_v54  ;;  %v3509_v54 = vor.u32 %v2740_v52, %v2512_v51  ;;  %v3520_v3 = vor.u32 %v2736_v0, %v2496_v62  ;;  %v2464_v25 = vld [vmem:[#allocation3 + $0x40] sm:$0xf]  ;;  %v2726_v26 = vld [vmem:[#allocation3 + $0x44] sm:$0xf]  ;;  %v2466_v29 = vld [vmem:[#allocation3 + $0x50] sm:$0xf0] }
  0x48   :  { %657 = vmatpush.bf16.msrb.mxu1 %v2329_v58  ;;  %v3511_v58 = vor.u32 %v2738_v53, %v2514_v55  ;;  %v3550_v31 = vor.u32 %v2726_v26, %v2466_v29  ;;  %v2472_v33 = vld [vmem:[#allocation3 + $0x48] sm:$0xf]  ;;  %v2729_v35 = vld [vmem:[#allocation3 + $0x54] sm:$0xf0]  ;;  %v2731_v36 = vld [vmem:[#allocation3 + $0x6c] sm:$0xf] }
  0x49   :  { %686 = vmatpush.bf16.msrb.mxu2 %v2205_v2  ;;  %v2498_v2 = vld [vmem:[#allocation3 + $0x90] sm:$0xf0]  ;;  %v3553_v40 = vor.u32 %v2729_v35, %v2472_v33  ;;  %v2490_v41 = vld [vmem:[#allocation3 + $0x78] sm:$0xf0]  ;;  %v2448_v45 = vld [vmem:[#allocation3 + $0x20] sm:$0xf] }
  0x4a   :  { %715 = vmatpush.bf16.msrb.mxu3 %v2333_v6  ;;  %v3522_v4 = vor.u32 %v2734_v1, %v2498_v2  ;;  %v2737_v6 = vld [vmem:[#allocation3 + $0x94] sm:$0xf0]  ;;  %v3555_v43 = vor.u32 %v2731_v36, %v2490_v41  ;;  %v2724_v46 = vld [vmem:[#allocation3 + $0x2c] sm:$0xf0]  ;;  %v2722_v47 = vld [vmem:[#allocation3 + $0x24] sm:$0xf] }
  0x4b   :  { %629 = vmatpush.bf16.msrb.mxu0 %v2185_v5  ;;  %v2504_v5 = vld [vmem:[#allocation3 + $0x88] sm:$0xf]  ;;  %v3565_v51 = vor.u32 %v2724_v46, %v2448_v45  ;;  %v2450_v52 = vld [vmem:[#allocation3 + $0x30] sm:$0xf0]  ;;  %v2725_v55 = vld [vmem:[#allocation3 + $0x34] sm:$0xf0] }
  0x4c   :  { %658 = vmatpush.bf16.msrb.mxu1 %v2313_v9  ;;  %v3525_v8 = vor.u32 %v2737_v6, %v2504_v5  ;;  %v2522_v9 = vld [vmem:[#allocation3 + $0xb8] sm:$0xf0]  ;;  %v2456_v53 = vld [vmem:[#allocation3 + $0x28] sm:$0xf]  ;;  %v3567_v56 = vor.u32 %v2722_v47, %v2450_v52  ;;  %v2727_v60 = vld [vmem:[#allocation3 + $0x4c] sm:$0xf] }
  0x4d   :  { %687 = vmatpush.bf16.msrb.mxu2 %v2189_v16  ;;  %v3527_v10 = vor.u32 %v2739_v7, %v2522_v9  ;;  %v2488_v16 = vld [vmem:[#allocation3 + $0x68] sm:$0xf]  ;;  %v3569_v57 = vor.u32 %v2725_v55, %v2456_v53  ;;  %v2474_v61 = vld [vmem:[#allocation3 + $0x58] sm:$0xf0]  ;;  %v2432_v62 = vld [vmem:[#allocation3] sm:$0xf] }
  0x4e   :  { %716 = vmatpush.bf16.msrb.mxu3 %v2317_v17  ;;  %524 = vmatmul.bf16.gmra.mxu0 %v3460_v18  ;;  %v2733_v17 = vld [vmem:[#allocation3 + $0x74] sm:$0xf0]  ;;  %v2718_v0 = vld [vmem:[#allocation3 + $0x4] sm:$0xf]  ;;  %v2434_v1 = vld [vmem:[#allocation3 + $0x10] sm:$0xf0] }
  0x4f   :  { %553 = vmatmul.bf16.gmra.mxu1 %v3462_v19  ;;  %969 = vmatpush.bf16.msra.mxu0 %v3468_v23  ;;  %v3541_v21 = vor.u32 %v2733_v17, %v2488_v16  ;;  %v3578_v5 = vor.u32 %v2718_v0, %v2434_v1  ;;  %v2723_v6 = vld [vmem:[#allocation3 + $0x2c] sm:$0xf]  ;;  %v2458_v7 = vld [vmem:[#allocation3 + $0x38] sm:$0xf0]  ;;  %v2440_v11 = vld [vmem:[#allocation3 + $0x8] sm:$0xf] }
  0x50   :  { %582 = vmatmul.bf16.gmra.mxu2 %v3460_v18  ;;  %982 = vmatpush.bf16.msra.mxu1 %v3470_v27  ;;  %v3581_v9 = vor.u32 %v2723_v6, %v2458_v7  ;;  %v2721_v12 = vld [vmem:[#allocation3 + $0x14] sm:$0xf0]  ;;  %v2719_v13 = vld [vmem:[#allocation3 + $0xc] sm:$0xf]  ;;  %v2442_v16 = vld [vmem:[#allocation3 + $0x18] sm:$0xf0] }
  0x51   :  { %611 = vmatmul.bf16.gmra.mxu3 %v3462_v19  ;;  %995 = vmatpush.bf16.msra.mxu2 %v3472_v28  ;;  %v3588_v15 = vor.u32 %v2721_v12, %v2440_v11  ;;  %v3590_v17 = vor.u32 %v2719_v13, %v2442_v16 }
  0x52   :  { %1008 = vmatpush.bf16.msra.mxu3 %v3483_v42 }
  0x53   :  { %970 = vmatpush.bf16.msra.mxu0 %v3475_v32 }
  0x54   :  { %983 = vmatpush.bf16.msra.mxu1 %v3479_v37 }
  0x55   :  { %996 = vmatpush.bf16.msra.mxu2 %v3481_v38 }
  0x56   :  { %1009 = vmatpush.bf16.msra.mxu3 %v3516_v63 }
  0x57   :  { %971 = vmatpush.bf16.msra.mxu0 %v3509_v54 }
  0x58   :  { %984 = vmatpush.bf16.msra.mxu1 %v3511_v58 }
  0x59   :  { %997 = vmatpush.bf16.msra.mxu2 %v3513_v59 }
  0x5a   :  { %1010 = vmatpush.bf16.msra.mxu3 %v3527_v10 }
  0x5b   :  { %972 = vmatpush.bf16.msra.mxu0 %v3520_v3 }
  0x5c   :  { %985 = vmatpush.bf16.msra.mxu1 %v3522_v4 }
  0x5d   :  { %998 = vmatpush.bf16.msra.mxu2 %v3525_v8 }
  0x5e   :  { %529 = vmatmul.bf16.gmra.mxu0 %v3501_v48 }
  0x5f   :  { %558 = vmatmul.bf16.gmra.mxu1 %v3503_v50  ;;  %973 = vmatpush.bf16.msra.mxu0 %v3537_v14 }
  0x60   :  { %587 = vmatmul.bf16.gmra.mxu2 %v3501_v48  ;;  %986 = vmatpush.bf16.msra.mxu1 %v3539_v20 }
  0x61   :  { %616 = vmatmul.bf16.gmra.mxu3 %v3503_v50  ;;  %999 = vmatpush.bf16.msra.mxu2 %v3541_v21 }
  0x64   :  { %987 = vmatpush.bf16.msra.mxu1 %v3550_v31 }
  0x65   :  { %1000 = vmatpush.bf16.msra.mxu2 %v3553_v40 }
  0x68   :  { %988 = vmatpush.bf16.msra.mxu1 %v3567_v56 }
  0x69   :  { %1001 = vmatpush.bf16.msra.mxu2 %v3569_v57 }
  0x6c   :  { %989 = vmatpush.bf16.msra.mxu1 %v3578_v5 }
  0x6d   :  { %1002 = vmatpush.bf16.msra.mxu2 %v3588_v15 }
  0x6e   :  { %630 = vmatmul.bf16.vlgmr.msrb.gmra.mxu0 %v3249_v44 }
  0x6f   :  { %659 = vmatmul.bf16.vlgmr.msrb.gmra.mxu1 %v3260_v49 }
  0x70   :  { %688 = vmatmul.bf16.vlgmr.msrb.gmra.mxu2 %v3249_v44  ;;  %v3544_v44 = vor.u32 %v2735_v22, %v2506_v24  ;;  %1106 = vmatpush.bf16.msrb.mxu1 %v3470_v27 }
  0x71   :  { %717 = vmatmul.bf16.vlgmr.msrb.gmra.mxu3 %v3260_v49  ;;  %v2728_v49 = vld [vmem:[#allocation3 + $0x4c] sm:$0xf0]  ;;  %1119 = vmatpush.bf16.msrb.mxu2 %v3472_v28 }
  0x72   :  { %v3548_v30 = vor.u32 %v2728_v49, %v2464_v25  ;;  %1011 = vmatpush.bf16.msra.mxu3 %v3544_v44 }
  0x74   :  { %974 = vmatpush.bf16.msra.mxu0 %v3548_v30  ;;  %1107 = vmatpush.bf16.msrb.mxu1 %v3479_v37 }
  0x75   :  { %1120 = vmatpush.bf16.msrb.mxu2 %v3481_v38 }
  0x76   :  { %1012 = vmatpush.bf16.msra.mxu3 %v3555_v43 }
  0x78   :  { %975 = vmatpush.bf16.msra.mxu0 %v3565_v51  ;;  %1108 = vmatpush.bf16.msrb.mxu1 %v3511_v58 }
  0x79   :  { %1121 = vmatpush.bf16.msrb.mxu2 %v3513_v59 }
  0x7c   :  { %1109 = vmatpush.bf16.msrb.mxu1 %v3522_v4 }
  0x7d   :  { %1122 = vmatpush.bf16.msrb.mxu2 %v3525_v8 }
  0x7e   :  { %635 = vmatmul.bf16.gmra.mxu0 %v3365_v34 }
  0x7f   :  { %664 = vmatmul.bf16.gmra.mxu1 %v3376_v39 }
  0x80   :  { %693 = vmatmul.bf16.gmra.mxu2 %v3365_v34  ;;  %v3572_v34 = vor.u32 %v2727_v60, %v2474_v61  ;;  %1110 = vmatpush.bf16.msrb.mxu1 %v3539_v20 }
  0x81   :  { %722 = vmatmul.bf16.gmra.mxu3 %v3376_v39  ;;  %v2720_v39 = vld [vmem:[#allocation3 + $0xc] sm:$0xf0]  ;;  %1123 = vmatpush.bf16.msrb.mxu2 %v3541_v21 }
  0x82   :  { %v3576_v2 = vor.u32 %v2720_v39, %v2432_v62  ;;  %1013 = vmatpush.bf16.msra.mxu3 %v3572_v34 }
  0x84   :  { %976 = vmatpush.bf16.msra.mxu0 %v3576_v2  ;;  %1111 = vmatpush.bf16.msrb.mxu1 %v3550_v31 }
  0x85   :  { %1124 = vmatpush.bf16.msrb.mxu2 %v3553_v40 }
  0x86   :  { %1014 = vmatpush.bf16.msra.mxu3 %v3581_v9 }
  0x88   :  { %1093 = vmatpush.bf16.msrb.mxu0 %v3468_v23  ;;  %1112 = vmatpush.bf16.msrb.mxu1 %v3567_v56 }
  0x89   :  { %1125 = vmatpush.bf16.msrb.mxu2 %v3569_v57 }
  0x8a   :  { %1015 = vmatpush.bf16.msra.mxu3 %v3590_v17 }
  0x8c   :  { %1094 = vmatpush.bf16.msrb.mxu0 %v3475_v32  ;;  %1113 = vmatpush.bf16.msrb.mxu1 %v3578_v5 }
  0x8d   :  { %1126 = vmatpush.bf16.msrb.mxu2 %v3588_v15 }
  0x8e   :  { %640 = vmatmul.bf16.gmra.mxu0 %v3460_v18  ;;  %1132 = vmatpush.bf16.msrb.mxu3 %v3483_v42 }
  0x8f   :  { %669 = vmatmul.bf16.gmra.mxu1 %v3462_v19 }
  0x90   :  { %698 = vmatmul.bf16.gmra.mxu2 %v3460_v18  ;;  %1095 = vmatpush.bf16.msrb.mxu0 %v3509_v54  ;;  %v3628_v18 = vld [vmem:[%s4046_s4] sm:$0xf] }
  0x91   :  { %727 = vmatmul.bf16.gmra.mxu3 %v3462_v19  ;;  %v802_v19 = vld [vmem:[%s4043_s1] sm:$0xff]  ;;  %v3647_v26 = vperm.slane %v3628_v18, 1 }
  0x92   :  { %1133 = vmatpush.bf16.msrb.mxu3 %v3516_v63 }
  0x94   :  { %1096 = vmatpush.bf16.msrb.mxu0 %v3520_v3 }
  0x96   :  { %1134 = vmatpush.bf16.msrb.mxu3 %v3527_v10 }
  0x98   :  { %1097 = vmatpush.bf16.msrb.mxu0 %v3537_v14 }
  0x9a   :  { %1135 = vmatpush.bf16.msrb.mxu3 %v3544_v44 }
  0x9c   :  { %1098 = vmatpush.bf16.msrb.mxu0 %v3548_v30 }
  0x9e   :  { %645 = vmatmul.bf16.gmra.mxu0 %v3501_v48  ;;  %1136 = vmatpush.bf16.msrb.mxu3 %v3555_v43 }
  0x9f   :  { %674 = vmatmul.bf16.gmra.mxu1 %v3503_v50 }
  0xa0   :  { %703 = vmatmul.bf16.gmra.mxu2 %v3501_v48  ;;  %1099 = vmatpush.bf16.msrb.mxu0 %v3565_v51  ;;  %v3637_v48 = vperm.slane %v3628_v18, 0 }
  0xa1   :  { %732 = vmatmul.bf16.gmra.mxu3 %v3503_v50  ;;  %v808_v50 = vpack.c.bf16 %v802_v19, %v802_v19 }
  0xa2   :  { %1137 = vmatpush.bf16.msrb.mxu3 %v3572_v34 }
  0xa4   :  { %1100 = vmatpush.bf16.msrb.mxu0 %v3576_v2 }
  0xa6   :  { %1138 = vmatpush.bf16.msrb.mxu3 %v3581_v9 }
  0xaa   :  { %1139 = vmatpush.bf16.msrb.mxu3 %v3590_v17 }
  0xab   :  { %v515_v22 = vpop.f32.mrf.mxu0 }
  0xac   :  { %v516_v24 = vadd.f32 %v515_v22, %v3637_v48  ;;  %v544_v25 = vpop.f32.mrf.mxu1 }
  0xae   :  { %v3644_v49 = vadd.f32 %v544_v25, %v516_v24  ;;  %977 = vmatmul.bf16.vlgmr.msra.gmra.mxu0 %v808_v50 }
  0xaf   :  { %990 = vmatmul.bf16.vlgmr.msra.gmra.mxu1 %v808_v50  ;;  %1217 = vmatpush.bf16.msra.mxu0 %v3468_v23 }
  0xb0   :  { %1003 = vmatmul.bf16.vlgmr.msra.gmra.mxu2 %v808_v50  ;;  %1230 = vmatpush.bf16.msra.mxu1 %v3470_v27 }
  0xb1   :  { %1016 = vmatmul.bf16.vlgmr.msra.gmra.mxu3 %v808_v50  ;;  %1243 = vmatpush.bf16.msra.mxu2 %v3472_v28 }
  0xb2   :  { %1256 = vmatpush.bf16.msra.mxu3 %v3483_v42 }
  0xb3   :  { %v573_v29 = vpop.f32.mrf.mxu2  ;;  %v3654_v36 = vpop.f32.mrf.mxu0  ;;  %1218 = vmatpush.bf16.msra.mxu0 %v3475_v32 }
  0xb4   :  { %v574_v33 = vadd.f32 %v573_v29, %v3647_v26  ;;  %v602_v35 = vpop.f32.mrf.mxu3  ;;  %v3656_v41 = vpop.f32.mrf.mxu1  ;;  %1231 = vmatpush.bf16.msra.mxu1 %v3479_v37 }
  0xb5   :  { %1244 = vmatpush.bf16.msra.mxu2 %v3481_v38 }
  0xb6   :  { %v3659_v45 = vadd.f32 %v602_v35, %v574_v33  ;;  %1257 = vmatpush.bf16.msra.mxu3 %v3516_v63 }
  0xb7   :  { %1219 = vmatpush.bf16.msra.mxu0 %v3509_v54 }
  0xb8   :  { %1232 = vmatpush.bf16.msra.mxu1 %v3511_v58 }
  0xb9   :  { %1245 = vmatpush.bf16.msra.mxu2 %v3513_v59 }
  0xba   :  { %1258 = vmatpush.bf16.msra.mxu3 %v3527_v10 }
  0xbb   :  { %v3667_v46 = vpop.f32.mrf.mxu2  ;;  %v520_v52 = vpop.f32.mrf.mxu0  ;;  %1220 = vmatpush.bf16.msra.mxu0 %v3520_v3 }
  0xbc   :  { %v3670_v47 = vpop.f32.mrf.mxu3  ;;  %v521_v53 = vadd.f32 %v520_v52, %v3637_v48  ;;  %v549_v55 = vpop.f32.mrf.mxu1  ;;  %1233 = vmatpush.bf16.msra.mxu1 %v3522_v4 }
  0xbd   :  { %1246 = vmatpush.bf16.msra.mxu2 %v3525_v8 }
  0xbe   :  { %v3676_v60 = vadd.f32 %v549_v55, %v521_v53  ;;  %1259 = vmatpush.bf16.msra.mxu3 %v3544_v44 }
  0xbf   :  { %1221 = vmatpush.bf16.msra.mxu0 %v3537_v14 }
  0xc0   :  { %4053 = vst [vmem:[#allocation9_spill] sm:$0xff] %v3676_v60  ;;  %1234 = vmatpush.bf16.msra.mxu1 %v3539_v20 }
  0xc1   :  { %1247 = vmatpush.bf16.msra.mxu2 %v3541_v21 }
  0xc2   :  { %1260 = vmatpush.bf16.msra.mxu3 %v3555_v43 }
  0xc3   :  { %v578_v61 = vpop.f32.mrf.mxu2  ;;  %v3684_v0 = vpop.f32.mrf.mxu0  ;;  %1222 = vmatpush.bf16.msra.mxu0 %v3548_v30 }
  0xc4   :  { %v579_v62 = vadd.f32 %v578_v61, %v3647_v26  ;;  %v607_v39 = vpop.f32.mrf.mxu3  ;;  %4054 = vst [vmem:[#allocation10_spill] sm:$0xff] %v3684_v0  ;;  %v3686_v1 = vpop.f32.mrf.mxu1  ;;  %1235 = vmatpush.bf16.msra.mxu1 %v3550_v31 }
  0xc5   :  { %4055 = vst [vmem:[#allocation11_spill] sm:$0xff] %v3686_v1  ;;  %1248 = vmatpush.bf16.msra.mxu2 %v3553_v40 }
  0xc6   :  { %v3689_v6 = vadd.f32 %v607_v39, %v579_v62  ;;  %1261 = vmatpush.bf16.msra.mxu3 %v3572_v34 }
  0xc7   :  { %1223 = vmatpush.bf16.msra.mxu0 %v3565_v51 }
  0xc8   :  { %4056 = vst [vmem:[#allocation12_spill] sm:$0xff] %v3689_v6  ;;  %1236 = vmatpush.bf16.msra.mxu1 %v3567_v56 }
  0xc9   :  { %1249 = vmatpush.bf16.msra.mxu2 %v3569_v57 }
  0xca   :  { %1262 = vmatpush.bf16.msra.mxu3 %v3581_v9 }
  0xcb   :  { %v3697_v7 = vpop.f32.mrf.mxu2  ;;  %v525_v12 = vpop.f32.mrf.mxu0  ;;  %1224 = vmatpush.bf16.msra.mxu0 %v3576_v2 }
  0xcc   :  { %4057 = vst [vmem:[#allocation13_spill] sm:$0xff] %v3697_v7  ;;  %v3700_v11 = vpop.f32.mrf.mxu3  ;;  %v526_v13 = vadd.f32 %v525_v12, %v3637_v48  ;;  %v554_v16 = vpop.f32.mrf.mxu1  ;;  %1237 = vmatpush.bf16.msra.mxu1 %v3578_v5 }
  0xcd   :  { %4058 = vst [vmem:[#allocation14_spill] sm:$0xff] %v3700_v11  ;;  %1250 = vmatpush.bf16.msra.mxu2 %v3588_v15 }
  0xce   :  { %v3706_v19 = vadd.f32 %v554_v16, %v526_v13  ;;  %1263 = vmatpush.bf16.msra.mxu3 %v3590_v17 }
  0xd0   :  { %4059 = vst [vmem:[#allocation15_spill] sm:$0xff] %v3706_v19 }
  0xd3   :  { %v583_v50 = vpop.f32.mrf.mxu2  ;;  %v3710_v25 = vpop.f32.mrf.mxu0 }
  0xd4   :  { %v584_v22 = vadd.f32 %v583_v50, %v3647_v26  ;;  %v612_v24 = vpop.f32.mrf.mxu3  ;;  %4060 = vst [vmem:[#allocation16_spill] sm:$0xff] %v3710_v25  ;;  %v3712_v29 = vpop.f32.mrf.mxu1 }
  0xd5   :  { %4061 = vst [vmem:[#allocation17_spill] sm:$0xff] %v3712_v29 }
  0xd6   :  { %v3714_v33 = vadd.f32 %v612_v24, %v584_v22  ;;  %v3731_v24 = vperm.slane %v3628_v18, 2 }
  0xd8   :  { %4062 = vst [vmem:[#allocation18_spill] sm:$0xff] %v3714_v33 }
  0xdb   :  { %v3716_v35 = vpop.f32.mrf.mxu2  ;;  %v530_v53 = vpop.f32.mrf.mxu0 }
  0xdc   :  { %4063 = vst [vmem:[#allocation19_spill] sm:$0xff] %v3716_v35  ;;  %v3718_v52 = vpop.f32.mrf.mxu3  ;;  %v531_v55 = vadd.f32 %v530_v53, %v3637_v48  ;;  %v559_v61 = vpop.f32.mrf.mxu1 }
  0xdd   :  { %4064 = vst [vmem:[#allocation20_spill] sm:$0xff] %v3718_v52 }
  0xde   :  { %v3721_v62 = vadd.f32 %v559_v61, %v531_v55 }
  0xe0   :  { %4065 = vst [vmem:[#allocation21_spill] sm:$0xff] %v3721_v62 }
  0xe3   :  { %v588_v39 = vpop.f32.mrf.mxu2  ;;  %v3724_v16 = vpop.f32.mrf.mxu0 }
  0xe4   :  { %v589_v12 = vadd.f32 %v588_v39, %v3647_v26  ;;  %v617_v13 = vpop.f32.mrf.mxu3  ;;  %4066 = vst [vmem:[#allocation22_spill] sm:$0xff] %v3724_v16  ;;  %v3726_v50 = vpop.f32.mrf.mxu1  ;;  %v141_v39 = vperm.slane %v3628_v18, 3 }
  0xe5   :  { %4067 = vst [vmem:[#allocation23_spill] sm:$0xff] %v3726_v50 }
  0xe6   :  { %v3728_v22 = vadd.f32 %v617_v13, %v589_v12 }
  0xe8   :  { %4068 = vst [vmem:[#allocation24_spill] sm:$0xff] %v3728_v22 }
  0xeb   :  { %v3733_v52 = vpop.f32.mrf.mxu2  ;;  %v631_v53 = vpop.f32.mrf.mxu0 }
  0xec   :  { %4069 = vst [vmem:[#allocation25_spill] sm:$0xff] %v3733_v52  ;;  %v3735_v29 = vpop.f32.mrf.mxu3  ;;  %v632_v55 = vadd.f32 %v631_v53, %v3731_v24  ;;  %v660_v61 = vpop.f32.mrf.mxu1 }
  0xed   :  { %4070 = vst [vmem:[#allocation26_spill] sm:$0xff] %v3735_v29 }
  0xee   :  { %v3738_v62 = vadd.f32 %v660_v61, %v632_v55 }
  0xf3   :  { %v689_v16 = vpop.f32.mrf.mxu2  ;;  %v3741_v12 = vpop.f32.mrf.mxu0 }
  0xf4   :  { %v690_v35 = vadd.f32 %v689_v16, %v141_v39  ;;  %v718_v50 = vpop.f32.mrf.mxu3  ;;  %4071 = vst [vmem:[#allocation27_spill] sm:$0xff] %v3741_v12  ;;  %v3743_v13 = vpop.f32.mrf.mxu1 }
  0xf5   :  { %4072 = vst [vmem:[#allocation28_spill] sm:$0xff] %v3743_v13 }
  0xf6   :  { %v3745_v22 = vadd.f32 %v718_v50, %v690_v35 }
  0xfb   :  { %v691_v52 = vpop.f32.mrf.mxu2  ;;  %v636_v33 = vpop.f32.mrf.mxu0 }
  0xfc   :  { %v692_v25 = vadd.f32 %v691_v52, %v141_v39  ;;  %v720_v29 = vpop.f32.mrf.mxu3  ;;  %v637_v53 = vadd.f32 %v636_v33, %v3731_v24  ;;  %v665_v19 = vpop.f32.mrf.mxu1 }
  0xfe   :  { %v3748_v55 = vadd.f32 %v720_v29, %v692_v25  ;;  %v3750_v61 = vadd.f32 %v665_v19, %v637_v53 }
 0x100   :  { %4073 = vst [vmem:[#allocation29_spill] sm:$0xff] %v3748_v55 }
 0x101   :  { %4074 = vst [vmem:[#allocation30_spill] sm:$0xff] %v3750_v61 }
 0x103   :  { %v694_v18 = vpop.f32.mrf.mxu2  ;;  %v638_v1 = vpop.f32.mrf.mxu0 }
 0x104   :  { %v695_v16 = vadd.f32 %v694_v18, %v141_v39  ;;  %v723_v11 = vpop.f32.mrf.mxu3  ;;  %v639_v7 = vadd.f32 %v638_v1, %v3731_v24  ;;  %v667_v0 = vpop.f32.mrf.mxu1 }
 0x106   :  { %v3753_v35 = vadd.f32 %v723_v11, %v695_v16  ;;  %v3755_v50 = vadd.f32 %v667_v0, %v639_v7 }
 0x108   :  { %4075 = vst [vmem:[#allocation31_spill] sm:$0xff] %v3753_v35 }
 0x109   :  { %4076 = vst [vmem:[#allocation32_spill] sm:$0xff] %v3755_v50 }
 0x10b   :  { %v696_v52 = vpop.f32.mrf.mxu2  ;;  %v641_v33 = vpop.f32.mrf.mxu0 }
 0x10c   :  { %v697_v6 = vadd.f32 %v696_v52, %v141_v39  ;;  %v725_v60 = vpop.f32.mrf.mxu3  ;;  %v642_v25 = vadd.f32 %v641_v33, %v3731_v24  ;;  %v670_v29 = vpop.f32.mrf.mxu1 }
 0x10e   :  { %v3758_v19 = vadd.f32 %v725_v60, %v697_v6  ;;  %v3760_v53 = vadd.f32 %v670_v29, %v642_v25 }
 0x110   :  { %4077 = vst [vmem:[#allocation33_spill] sm:$0xff] %v3758_v19 }
 0x111   :  { %4078 = vst [vmem:[#allocation34_spill] sm:$0xff] %v3760_v53 }
 0x113   :  { %v699_v18 = vpop.f32.mrf.mxu2  ;;  %v643_v1 = vpop.f32.mrf.mxu0 }
 0x114   :  { %v700_v61 = vadd.f32 %v699_v18, %v141_v39  ;;  %v728_v55 = vpop.f32.mrf.mxu3  ;;  %v644_v11 = vadd.f32 %v643_v1, %v3731_v24  ;;  %v672_v16 = vpop.f32.mrf.mxu1 }
 0x116   :  { %v3763_v0 = vadd.f32 %v728_v55, %v700_v61  ;;  %v3765_v7 = vadd.f32 %v672_v16, %v644_v11 }
 0x118   :  { %4079 = vst [vmem:[#allocation35_spill] sm:$0xff] %v3763_v0 }
 0x119   :  { %4080 = vst [vmem:[#allocation36_spill] sm:$0xff] %v3765_v7 }
 0x11b   :  { %v701_v52 = vpop.f32.mrf.mxu2  ;;  %v646_v33 = vpop.f32.mrf.mxu0 }
 0x11c   :  { %v702_v50 = vadd.f32 %v701_v52, %v141_v39  ;;  %v730_v35 = vpop.f32.mrf.mxu3  ;;  %v647_v60 = vadd.f32 %v646_v33, %v3731_v24  ;;  %v675_v6 = vpop.f32.mrf.mxu1 }
 0x11e   :  { %v3768_v25 = vadd.f32 %v730_v35, %v702_v50  ;;  %v3770_v29 = vadd.f32 %v675_v6, %v647_v60 }
 0x120   :  { %4081 = vst [vmem:[#allocation37_spill] sm:$0xff] %v3768_v25 }
 0x121   :  { %4082 = vst [vmem:[#allocation38_spill] sm:$0xff] %v3770_v29 }
 0x123   :  { %v704_v18 = vpop.f32.mrf.mxu2  ;;  %v648_v1 = vpop.f32.mrf.mxu0 }
 0x124   :  { %v705_v53 = vadd.f32 %v704_v18, %v141_v39  ;;  %v733_v19 = vpop.f32.mrf.mxu3  ;;  %v649_v55 = vadd.f32 %v648_v1, %v3731_v24  ;;  %v677_v61 = vpop.f32.mrf.mxu1 }
 0x126   :  { %v3773_v11 = vadd.f32 %v733_v19, %v705_v53  ;;  %v3775_v16 = vadd.f32 %v677_v61, %v649_v55 }
 0x128   :  { %4083 = vst [vmem:[#allocation39_spill] sm:$0xff] %v3773_v11 }
 0x129   :  { %4084 = vst [vmem:[#allocation40_spill] sm:$0xff] %v3775_v16 }
 0x12b   :  { %v706_v52 = vpop.f32.mrf.mxu2  ;;  %v978_v33 = vpop.f32.mrf.mxu0 }
 0x12c   :  { %v707_v7 = vadd.f32 %v706_v52, %v141_v39  ;;  %v735_v0 = vpop.f32.mrf.mxu3  ;;  %v1021_v35 = vadd.f32 %v978_v33, %v3644_v49  ;;  %v991_v50 = vpop.f32.mrf.mxu1 }
 0x12d   :  { %v1022_v6 = vadd.f32 %v991_v50, %v3659_v45 }
 0x12e   :  { %v3778_v60 = vadd.f32 %v735_v0, %v707_v7  ;;  %v2558_v18 = vmul.f32 -1.442695, %v1021_v35 }
 0x12f   :  { %v2559_v29 = vmul.f32 -1.442695, %v1022_v6 }
 0x130   :  { %4085 = vst [vmem:[#allocation41_spill] sm:$0xff] %v3778_v60  ;;  %2773 = vpow2.f32 %v2558_v18 }
 0x131   :  { %2775 = vpow2.f32 %v2559_v29 }
 0x133   :  { %v1004_v1 = vpop.f32.mrf.mxu2  ;;  %v980_v55 = vpop.f32.mrf.mxu0 }
 0x134   :  { %v1023_v19 = vadd.f32 %v1004_v1, %v3738_v62  ;;  %v1017_v53 = vpop.f32.mrf.mxu3  ;;  %v993_v61 = vpop.f32.mrf.mxu1 }
 0x135   :  { %v1024_v29 = vadd.f32 %v1017_v53, %v3745_v22 }
 0x136   :  { %v2560_v39 = vmul.f32 -1.442695, %v1023_v19  ;;  %v2774_v52 = vpop.eup %2773 }
 0x137   :  { %v2776_v16 = vpop.eup %2775  ;;  %v1034_v11 = vadd.f32 1.0, %v2774_v52 }
 0x138   :  { %2777 = vpow2.f32 %v2560_v39  ;;  %v1035_v49 = vadd.f32 1.0, %v2776_v16 }
 0x139   :  { %2779 = vrcp.f32 %v1034_v11  ;;  %v1048_v19 = vand.u32 2147483648, %v1034_v11  ;;  %v1046_v16 = vand.u32 2147483647, %v1034_v11  ;;  %vm1042_vm2 = vweird.f32 %v1034_v11 }
 0x13a   :  { %2781 = vrcp.f32 %v1035_v49  ;;  %v1063_v55 = vand.u32 2147483648, %v1035_v49  ;;  %v1061_v52 = vand.u32 2147483647, %v1035_v49  ;;  %vm1057_vm3 = vweird.f32 %v1035_v49 }
 0x13b   :  { %v1006_v0 = vpop.f32.mrf.mxu2  ;;  %v1049_v53 = vor.u32 1.1754944e-38, %v1048_v19  ;;  %vm1047_vm6 = vcmp.eq.f32.partialorder %v1046_v16, 8.507059e+37 }
 0x13c   :  { %v1019_v45 = vpop.f32.mrf.mxu3  ;;  %vm1062_vm7 = vcmp.eq.f32.partialorder %v1061_v52, 8.507059e+37 }
 0x13e   :  { %v2778_v7 = vpop.eup %2777 }
 0x13f   :  { %v1036_v33 = vadd.f32 1.0, %v2778_v7  ;;  %v2780_v35 = vpop.eup %2779 }
 0x140   :  { %v2782_v50 = vpop.eup %2781  ;;  %v1038_v62 = vmul.f32 %v2780_v35, %v1034_v11  ;;  %vm1043_vm0 = vweird.f32 %v2780_v35 }
 0x141   :  { %2783 = vrcp.f32 %v1036_v33  ;;  %v1053_v6 = vmul.f32 %v2782_v50, %v1035_v49  ;;  %vm1058_vm1 = vweird.f32 %v2782_v50  ;;  %vm1044_vm4 = vmor %vm1042_vm2, %vm1043_vm0  ;;  %vm1072_vm9 = vweird.f32 %v1036_v33 }
 0x142   :  { %v1039_v18 = vsub.f32 1.0, %v1038_v62  ;;  %2785 = vtanh.f32 %v1024_v29  ;;  %vm1059_vm5 = vmor %vm1057_vm3, %vm1058_vm1  ;;  %v1064_v62 = vor.u32 1.1754944e-38, %v1063_v55  ;;  %v803_v29 = vld [vmem:[%s4044_s2] sm:$0xff]  ;;  %v1078_v55 = vand.u32 2147483648, %v1036_v33 }
 0x143   :  { %v1054_v1 = vsub.f32 1.0, %v1053_v6 }
 0x144   :  { %v1040_v61 = vmul.f32 %v2780_v35, %v1039_v18  ;;  %v1079_v16 = vor.u32 1.1754944e-38, %v1078_v55 }
 0x145   :  { %v1055_v39 = vmul.f32 %v2782_v50, %v1054_v1 }
 0x146   :  { %v1041_v45 = vadd.f32 %v2780_v35, %v1040_v61 }
 0x147   :  { %v2784_v0 = vpop.eup %2783  ;;  %v1056_v7 = vadd.f32 %v2782_v50, %v1055_v39  ;;  %v1076_v39 = vand.u32 2147483647, %v1036_v33 }
 0x148   :  { %v1068_v22 = vmul.f32 %v2784_v0, %v1036_v33  ;;  %v1045_v6 = vsel %vm1044_vm4, %v2780_v35, %v1041_v45  ;;  %v2786_v18 = vpop.eup %2785  ;;  %vm1073_vm8 = vweird.f32 %v2784_v0 }
 0x149   :  { %v1050_v60 = vsel %vm1047_vm6, %v1049_v53, %v1045_v6  ;;  %v1060_v25 = vsel %vm1059_vm5, %v2782_v50, %v1056_v7  ;;  %vm1074_vm10 = vmor %vm1072_vm9, %vm1073_vm8  ;;  %vm1077_vm11 = vcmp.eq.f32.partialorder %v1076_v39, 8.507059e+37 }
 0x14a   :  { %v1069_v1 = vsub.f32 1.0, %v1068_v22  ;;  %v1065_v61 = vsel %vm1062_vm7, %v1064_v62, %v1060_v25  ;;  %v1084_v11 = vmul.f32 %v2786_v18, %v1050_v60  ;;  %v576_v60 = vadd.f32 %v3667_v46, %v3647_v26 }
 0x14b   :  { %v1083_v13 = vmul.f32 %v1065_v61, %v803_v29  ;;  %v4086_v29 = vld [vmem:[#allocation27_spill] sm:$0xff]  ;;  %v4087_v61 = vld [vmem:[#allocation28_spill] sm:$0xff] }
 0x14c   :  { %v1070_v49 = vmul.f32 %v2784_v0, %v1069_v1  ;;  %v634_v6 = vadd.f32 %v4086_v29, %v3731_v24 }
 0x14d   :  { %v3786_v12 = vadd.f32 %v1084_v11, %v1083_v13  ;;  %v518_v13 = vadd.f32 %v3654_v36, %v3637_v48 }
 0x14e   :  { %v1071_v19 = vadd.f32 %v2784_v0, %v1070_v49  ;;  %v663_v11 = vadd.f32 %v4087_v61, %v634_v6 }
 0x14f   :  { %2787 = vtanh.f32 %v3786_v12  ;;  %v547_v33 = vadd.f32 %v3656_v41, %v518_v13 }
 0x150   :  { %v1075_v35 = vsel %vm1074_vm10, %v2784_v0, %v1071_v19  ;;  %v605_v0 = vadd.f32 %v3670_v47, %v576_v60  ;;  %v4088_v60 = vld [vmem:[#allocation29_spill] sm:$0xff] }
 0x151   :  { %v1080_v50 = vsel %vm1077_vm11, %v1079_v16, %v1075_v35 }
 0x155   :  { %v2788_v45 = vpop.eup %2787 }
 0x156   :  { %v1087_v52 = vmul.f32 %v2788_v45, %v1080_v50 }
 0x158   :  { %v3789_v25 = vpack.c.bf16 %v1087_v52, %v1087_v52 }
 0x15a   :  { %1101 = vmatmul.bf16.vlgmr.msrb.gmra.mxu0 %v3789_v25  ;;  %1114 = vmatmul.bf16.vlgmr.msrb.gmra.mxu1 %v3789_v25 }
 0x15b   :  { %1127 = vmatmul.bf16.vlgmr.msrb.gmra.mxu2 %v3789_v25  ;;  %1140 = vmatmul.bf16.vlgmr.msrb.gmra.mxu3 %v3789_v25 }
 0x15c   :  { %1341 = vmatpush.bf16.msrb.mxu0 %v3468_v23  ;;  %1354 = vmatpush.bf16.msrb.mxu1 %v3470_v27 }
 0x15d   :  { %1367 = vmatpush.bf16.msrb.mxu2 %v3472_v28  ;;  %1380 = vmatpush.bf16.msrb.mxu3 %v3483_v42 }
 0x160   :  { %1342 = vmatpush.bf16.msrb.mxu0 %v3475_v32  ;;  %1355 = vmatpush.bf16.msrb.mxu1 %v3479_v37 }
 0x161   :  { %1368 = vmatpush.bf16.msrb.mxu2 %v3481_v38  ;;  %1381 = vmatpush.bf16.msrb.mxu3 %v3516_v63 }
 0x164   :  { %1343 = vmatpush.bf16.msrb.mxu0 %v3509_v54  ;;  %1356 = vmatpush.bf16.msrb.mxu1 %v3511_v58 }
 0x165   :  { %1369 = vmatpush.bf16.msrb.mxu2 %v3513_v59  ;;  %1382 = vmatpush.bf16.msrb.mxu3 %v3527_v10 }
 0x168   :  { %1344 = vmatpush.bf16.msrb.mxu0 %v3520_v3  ;;  %1357 = vmatpush.bf16.msrb.mxu1 %v3522_v4 }
 0x169   :  { %1370 = vmatpush.bf16.msrb.mxu2 %v3525_v8  ;;  %1383 = vmatpush.bf16.msrb.mxu3 %v3544_v44 }
 0x16c   :  { %1345 = vmatpush.bf16.msrb.mxu0 %v3537_v14  ;;  %1358 = vmatpush.bf16.msrb.mxu1 %v3539_v20 }
 0x16d   :  { %1371 = vmatpush.bf16.msrb.mxu2 %v3541_v21  ;;  %1384 = vmatpush.bf16.msrb.mxu3 %v3555_v43 }
 0x170   :  { %1346 = vmatpush.bf16.msrb.mxu0 %v3548_v30  ;;  %1359 = vmatpush.bf16.msrb.mxu1 %v3550_v31 }
 0x171   :  { %1372 = vmatpush.bf16.msrb.mxu2 %v3553_v40  ;;  %1385 = vmatpush.bf16.msrb.mxu3 %v3572_v34 }
 0x174   :  { %1347 = vmatpush.bf16.msrb.mxu0 %v3565_v51  ;;  %1360 = vmatpush.bf16.msrb.mxu1 %v3567_v56 }
 0x175   :  { %1373 = vmatpush.bf16.msrb.mxu2 %v3569_v57  ;;  %1386 = vmatpush.bf16.msrb.mxu3 %v3581_v9 }
 0x178   :  { %1348 = vmatpush.bf16.msrb.mxu0 %v3576_v2  ;;  %1361 = vmatpush.bf16.msrb.mxu1 %v3578_v5 }
 0x179   :  { %1374 = vmatpush.bf16.msrb.mxu2 %v3588_v15  ;;  %1387 = vmatpush.bf16.msrb.mxu3 %v3590_v17 }
 0x1d7   :  { %v1102_v22 = vpop.f32.mrf.mxu0  ;;  %v1115_v53 = vpop.f32.mrf.mxu1 }
 0x1d8   :  { %v1145_v7 = vadd.f32 %v1102_v22, %v547_v33  ;;  %v1146_v62 = vadd.f32 %v1115_v53, %v605_v0 }
 0x1da   :  { %v2561_v18 = vmul.f32 -1.442695, %v1145_v7  ;;  %v2562_v1 = vmul.f32 -1.442695, %v1146_v62 }
 0x1dc   :  { %2789 = vpow2.f32 %v2561_v18 }
 0x1dd   :  { %2791 = vpow2.f32 %v2562_v1 }
 0x1de   :  { %v1128_v36 = vpop.f32.mrf.mxu2  ;;  %v1141_v49 = vpop.f32.mrf.mxu3 }
 0x1df   :  { %v1147_v46 = vadd.f32 %v1128_v36, %v663_v11  ;;  %v1104_v19 = vpop.f32.mrf.mxu0  ;;  %v1117_v41 = vpop.f32.mrf.mxu1  ;;  %v1148_v33 = vadd.f32 %v1141_v49, %v4088_v60 }
 0x1e1   :  { %v2563_v55 = vmul.f32 -1.442695, %v1147_v46 }
 0x1e2   :  { %v2790_v47 = vpop.eup %2789 }
 0x1e3   :  { %v2792_v39 = vpop.eup %2791  ;;  %v1158_v35 = vadd.f32 1.0, %v2790_v47  ;;  %2793 = vpow2.f32 %v2563_v55 }
 0x1e4   :  { %v1159_v16 = vadd.f32 1.0, %v2792_v39 }
 0x1e5   :  { %2795 = vrcp.f32 %v1158_v35  ;;  %v1172_v29 = vand.u32 2147483648, %v1158_v35  ;;  %v1170_v1 = vand.u32 2147483647, %v1158_v35  ;;  %vm1166_vm14 = vweird.f32 %v1158_v35 }
 0x1e6   :  { %2797 = vrcp.f32 %v1159_v16  ;;  %v1130_v24 = vpop.f32.mrf.mxu2  ;;  %v1143_v45 = vpop.f32.mrf.mxu3  ;;  %v1187_v6 = vand.u32 2147483648, %v1159_v16  ;;  %v1185_v11 = vand.u32 2147483647, %v1159_v16  ;;  %vm1181_vm15 = vweird.f32 %v1159_v16 }
 0x1e7   :  { %v1173_v19 = vor.u32 1.1754944e-38, %v1172_v29  ;;  %vm1171_vm2 = vcmp.eq.f32.partialorder %v1170_v1, 8.507059e+37 }
 0x1e8   :  { %v1188_v55 = vor.u32 1.1754944e-38, %v1187_v6  ;;  %vm1186_vm3 = vcmp.eq.f32.partialorder %v1185_v11, 8.507059e+37 }
 0x1e9   :  { %v2794_v50 = vpop.eup %2793 }
 0x1ea   :  { %v1160_v52 = vadd.f32 1.0, %v2794_v50 }
 0x1eb   :  { %v2796_v13 = vpop.eup %2795 }
 0x1ec   :  { %v2798_v0 = vpop.eup %2797  ;;  %v1162_v22 = vmul.f32 %v2796_v13, %v1158_v35  ;;  %2799 = vrcp.f32 %v1160_v52  ;;  %vm1167_vm12 = vweird.f32 %v2796_v13  ;;  %vm1196_vm5 = vweird.f32 %v1160_v52 }
 0x1ed   :  { %v1177_v53 = vmul.f32 %v2798_v0, %v1159_v16  ;;  %2801 = vtanh.f32 %v1148_v33  ;;  %vm1182_vm13 = vweird.f32 %v2798_v0  ;;  %vm1168_vm0 = vmor %vm1166_vm14, %vm1167_vm12 }
 0x1ee   :  { %v1163_v7 = vsub.f32 1.0, %v1162_v22  ;;  %vm1183_vm1 = vmor %vm1181_vm15, %vm1182_vm13 }
 0x1ef   :  { %v1178_v62 = vsub.f32 1.0, %v1177_v53 }
 0x1f0   :  { %v1164_v18 = vmul.f32 %v2796_v13, %v1163_v7  ;;  %v1202_v7 = vand.u32 2147483648, %v1160_v52 }
 0x1f1   :  { %v1179_v61 = vmul.f32 %v2798_v0, %v1178_v62 }
 0x1f2   :  { %v2800_v36 = vpop.eup %2799  ;;  %v1165_v46 = vadd.f32 %v2796_v13, %v1164_v18  ;;  %v1203_v29 = vor.u32 1.1754944e-38, %v1202_v7 }
 0x1f3   :  { %v1192_v49 = vmul.f32 %v2800_v36, %v1160_v52  ;;  %v1180_v41 = vadd.f32 %v2798_v0, %v1179_v61  ;;  %v2802_v39 = vpop.eup %2801  ;;  %vm1197_vm4 = vweird.f32 %v2800_v36  ;;  %v4089_v61 = vld [vmem:[#allocation9_spill] sm:$0xff] }
 0x1f4   :  { %v1169_v47 = vsel %vm1168_vm0, %v2796_v13, %v1165_v46  ;;  %v1200_v13 = vand.u32 2147483647, %v1160_v52  ;;  %vm1198_vm6 = vmor %vm1196_vm5, %vm1197_vm4 }
 0x1f5   :  { %v1193_v24 = vsub.f32 1.0, %v1192_v49  ;;  %v1174_v45 = vsel %vm1171_vm2, %v1173_v19, %v1169_v47  ;;  %v1184_v50 = vsel %vm1183_vm1, %v2798_v0, %v1180_v41  ;;  %v4091_v47 = vld [vmem:[#allocation30_spill] sm:$0xff] }
 0x1f6   :  { %v1189_v60 = vsel %vm1186_vm3, %v1188_v55, %v1184_v50  ;;  %v1208_v33 = vmul.f32 %v2802_v39, %v1174_v45  ;;  %vm1201_vm7 = vcmp.eq.f32.partialorder %v1200_v13, 8.507059e+37 }
 0x1f7   :  { %v1207_v22 = vmul.f32 %v1189_v60, %v3786_v12  ;;  %v1194_v53 = vmul.f32 %v2800_v36, %v1193_v24 }
 0x1f9   :  { %v3838_v35 = vadd.f32 %v1208_v33, %v1207_v22  ;;  %v1195_v16 = vadd.f32 %v2800_v36, %v1194_v53 }
 0x1fb   :  { %2803 = vtanh.f32 %v3838_v35  ;;  %v1199_v62 = vsel %vm1198_vm6, %v2800_v36, %v1195_v16  ;;  %v4090_v36 = vld [vmem:[#allocation12_spill] sm:$0xff] }
 0x1fc   :  { %v1204_v6 = vsel %vm1201_vm7, %v1203_v29, %v1199_v62 }
 0x201   :  { %v2804_v0 = vpop.eup %2803 }
 0x202   :  { %v1211_v18 = vmul.f32 %v2804_v0, %v1204_v6  ;;  %v4092_v0 = vld [vmem:[#allocation31_spill] sm:$0xff] }
 0x204   :  { %v1216_v1 = vpack.c.bf16 %v1211_v18, %v1211_v18 }
 0x206   :  { %1225 = vmatmul.bf16.vlgmr.msra.gmra.mxu0 %v1216_v1  ;;  %1238 = vmatmul.bf16.vlgmr.msra.gmra.mxu1 %v1216_v1 }
 0x207   :  { %1251 = vmatmul.bf16.vlgmr.msra.gmra.mxu2 %v1216_v1  ;;  %1264 = vmatmul.bf16.vlgmr.msra.gmra.mxu3 %v1216_v1 }
 0x208   :  { %1465 = vmatpush.bf16.msra.mxu0 %v3468_v23  ;;  %1478 = vmatpush.bf16.msra.mxu1 %v3470_v27 }
 0x209   :  { %1491 = vmatpush.bf16.msra.mxu2 %v3472_v28  ;;  %1504 = vmatpush.bf16.msra.mxu3 %v3483_v42 }
 0x20c   :  { %1466 = vmatpush.bf16.msra.mxu0 %v3475_v32  ;;  %1479 = vmatpush.bf16.msra.mxu1 %v3479_v37 }
 0x20d   :  { %1492 = vmatpush.bf16.msra.mxu2 %v3481_v38  ;;  %1505 = vmatpush.bf16.msra.mxu3 %v3516_v63 }
 0x210   :  { %1467 = vmatpush.bf16.msra.mxu0 %v3509_v54  ;;  %1480 = vmatpush.bf16.msra.mxu1 %v3511_v58 }
 0x211   :  { %1493 = vmatpush.bf16.msra.mxu2 %v3513_v59  ;;  %1506 = vmatpush.bf16.msra.mxu3 %v3527_v10 }
 0x214   :  { %1468 = vmatpush.bf16.msra.mxu0 %v3520_v3  ;;  %1481 = vmatpush.bf16.msra.mxu1 %v3522_v4 }
 0x215   :  { %1494 = vmatpush.bf16.msra.mxu2 %v3525_v8  ;;  %1507 = vmatpush.bf16.msra.mxu3 %v3544_v44 }
 0x218   :  { %1469 = vmatpush.bf16.msra.mxu0 %v3537_v14  ;;  %1482 = vmatpush.bf16.msra.mxu1 %v3539_v20 }
 0x219   :  { %1495 = vmatpush.bf16.msra.mxu2 %v3541_v21  ;;  %1508 = vmatpush.bf16.msra.mxu3 %v3555_v43 }
 0x21c   :  { %1470 = vmatpush.bf16.msra.mxu0 %v3548_v30  ;;  %1483 = vmatpush.bf16.msra.mxu1 %v3550_v31 }
 0x21d   :  { %1496 = vmatpush.bf16.msra.mxu2 %v3553_v40  ;;  %1509 = vmatpush.bf16.msra.mxu3 %v3572_v34 }
 0x220   :  { %1471 = vmatpush.bf16.msra.mxu0 %v3565_v51  ;;  %1484 = vmatpush.bf16.msra.mxu1 %v3567_v56 }
 0x221   :  { %1497 = vmatpush.bf16.msra.mxu2 %v3569_v57  ;;  %1510 = vmatpush.bf16.msra.mxu3 %v3581_v9 }
 0x224   :  { %1472 = vmatpush.bf16.msra.mxu0 %v3576_v2  ;;  %1485 = vmatpush.bf16.msra.mxu1 %v3578_v5 }
 0x225   :  { %1498 = vmatpush.bf16.msra.mxu2 %v3588_v15  ;;  %1511 = vmatpush.bf16.msra.mxu3 %v3590_v17 }
 0x283   :  { %v1226_v12 = vpop.f32.mrf.mxu0  ;;  %v1239_v52 = vpop.f32.mrf.mxu1 }
 0x284   :  { %v1269_v11 = vadd.f32 %v1226_v12, %v4089_v61  ;;  %v1270_v46 = vadd.f32 %v1239_v52, %v4090_v36 }
 0x286   :  { %v2564_v49 = vmul.f32 -1.442695, %v1269_v11  ;;  %v2565_v19 = vmul.f32 -1.442695, %v1270_v46 }
 0x288   :  { %2805 = vpow2.f32 %v2564_v49 }
 0x289   :  { %2807 = vpow2.f32 %v2565_v19 }
 0x28a   :  { %v1252_v41 = vpop.f32.mrf.mxu2  ;;  %v1265_v55 = vpop.f32.mrf.mxu3 }
 0x28b   :  { %v1271_v39 = vadd.f32 %v1252_v41, %v4091_v47  ;;  %v1228_v24 = vpop.f32.mrf.mxu0  ;;  %v1241_v45 = vpop.f32.mrf.mxu1  ;;  %v1272_v6 = vadd.f32 %v1265_v55, %v4092_v0 }
 0x28d   :  { %v2566_v50 = vmul.f32 -1.442695, %v1271_v39 }
 0x28e   :  { %v2806_v60 = vpop.eup %2805 }
 0x28f   :  { %v2808_v33 = vpop.eup %2807  ;;  %v1282_v22 = vadd.f32 1.0, %v2806_v60  ;;  %2809 = vpow2.f32 %v2566_v50 }
 0x290   :  { %v1283_v53 = vadd.f32 1.0, %v2808_v33 }
 0x291   :  { %2811 = vrcp.f32 %v1282_v22  ;;  %v1296_v11 = vand.u32 2147483648, %v1282_v22  ;;  %v1294_v49 = vand.u32 2147483647, %v1282_v22  ;;  %vm1290_vm10 = vweird.f32 %v1282_v22 }
 0x292   :  { %2813 = vrcp.f32 %v1283_v53  ;;  %v1254_v16 = vpop.f32.mrf.mxu2  ;;  %v1267_v7 = vpop.f32.mrf.mxu3  ;;  %v1311_v36 = vand.u32 2147483648, %v1283_v53  ;;  %v1309_v41 = vand.u32 2147483647, %v1283_v53  ;;  %vm1305_vm11 = vweird.f32 %v1283_v53 }
 0x293   :  { %v1297_v24 = vor.u32 1.1754944e-38, %v1296_v11  ;;  %vm1295_vm14 = vcmp.eq.f32.partialorder %v1294_v49, 8.507059e+37 }
 0x294   :  { %v1312_v50 = vor.u32 1.1754944e-38, %v1311_v36  ;;  %vm1310_vm15 = vcmp.eq.f32.partialorder %v1309_v41, 8.507059e+37 }
 0x295   :  { %v2810_v13 = vpop.eup %2809 }
 0x296   :  { %v1284_v62 = vadd.f32 1.0, %v2810_v13 }
 0x297   :  { %v2812_v29 = vpop.eup %2811 }
 0x298   :  { %v2814_v18 = vpop.eup %2813  ;;  %v1286_v1 = vmul.f32 %v2812_v29, %v1282_v22  ;;  %2815 = vrcp.f32 %v1284_v62  ;;  %vm1291_vm8 = vweird.f32 %v2812_v29  ;;  %vm1320_vm1 = vweird.f32 %v1284_v62 }
 0x299   :  { %v1301_v12 = vmul.f32 %v2814_v18, %v1283_v53  ;;  %2817 = vtanh.f32 %v1272_v6  ;;  %vm1306_vm9 = vweird.f32 %v2814_v18  ;;  %vm1292_vm12 = vmor %vm1290_vm10, %vm1291_vm8 }
 0x29a   :  { %v1287_v52 = vsub.f32 1.0, %v1286_v1  ;;  %vm1307_vm13 = vmor %vm1305_vm11, %vm1306_vm9 }
 0x29b   :  { %v1302_v61 = vsub.f32 1.0, %v1301_v12 }
 0x29c   :  { %v1288_v46 = vmul.f32 %v2812_v29, %v1287_v52  ;;  %v1326_v52 = vand.u32 2147483648, %v1284_v62 }
 0x29d   :  { %v1303_v19 = vmul.f32 %v2814_v18, %v1302_v61 }
 0x29e   :  { %v2816_v47 = vpop.eup %2815  ;;  %v1289_v39 = vadd.f32 %v2812_v29, %v1288_v46  ;;  %v1327_v11 = vor.u32 1.1754944e-38, %v1326_v52 }
 0x29f   :  { %v1316_v55 = vmul.f32 %v2816_v47, %v1284_v62  ;;  %v1304_v45 = vadd.f32 %v2814_v18, %v1303_v19  ;;  %v2818_v33 = vpop.eup %2817  ;;  %vm1321_vm0 = vweird.f32 %v2816_v47  ;;  %v4094_v19 = vld [vmem:[#allocation13_spill] sm:$0xff] }
 0x2a0   :  { %v1293_v60 = vsel %vm1292_vm12, %v2812_v29, %v1289_v39  ;;  %v1324_v29 = vand.u32 2147483647, %v1284_v62  ;;  %vm1322_vm2 = vmor %vm1320_vm1, %vm1321_vm0  ;;  %v581_v41 = vadd.f32 %v4094_v19, %v3647_v26  ;;  %v4098_v19 = vld [vmem:[#allocation33_spill] sm:$0xff] }
 0x2a1   :  { %v1317_v16 = vsub.f32 1.0, %v1316_v55  ;;  %v1298_v7 = vsel %vm1295_vm14, %v1297_v24, %v1293_v60  ;;  %v1308_v13 = vsel %vm1307_vm13, %v2814_v18, %v1304_v45  ;;  %v4096_v55 = vld [vmem:[#allocation14_spill] sm:$0xff] }
 0x2a2   :  { %v1313_v0 = vsel %vm1310_vm15, %v1312_v50, %v1308_v13  ;;  %v1332_v6 = vmul.f32 %v2818_v33, %v1298_v7  ;;  %vm1325_vm3 = vcmp.eq.f32.partialorder %v1324_v29, 8.507059e+37  ;;  %v610_v24 = vadd.f32 %v4096_v55, %v581_v41 }
 0x2a3   :  { %v1331_v1 = vmul.f32 %v1313_v0, %v3838_v35  ;;  %v1318_v12 = vmul.f32 %v2816_v47, %v1317_v16  ;;  %v4093_v35 = vld [vmem:[#allocation10_spill] sm:$0xff] }
 0x2a4   :  { %v523_v62 = vadd.f32 %v4093_v35, %v3637_v48 }
 0x2a5   :  { %v3878_v22 = vadd.f32 %v1332_v6, %v1331_v1  ;;  %v1319_v53 = vadd.f32 %v2816_v47, %v1318_v12  ;;  %v4097_v6 = vld [vmem:[#allocation32_spill] sm:$0xff] }
 0x2a7   :  { %2819 = vtanh.f32 %v3878_v22  ;;  %v1323_v61 = vsel %vm1322_vm2, %v2816_v47, %v1319_v53  ;;  %v4095_v47 = vld [vmem:[#allocation11_spill] sm:$0xff] }
 0x2a8   :  { %v1328_v36 = vsel %vm1325_vm3, %v1327_v11, %v1323_v61  ;;  %v552_v39 = vadd.f32 %v4095_v47, %v523_v62 }
 0x2ad   :  { %v2820_v18 = vpop.eup %2819 }
 0x2ae   :  { %v1335_v46 = vmul.f32 %v2820_v18, %v1328_v36 }
 0x2b0   :  { %v1340_v49 = vpack.c.bf16 %v1335_v46, %v1335_v46 }
 0x2b2   :  { %1349 = vmatmul.bf16.vlgmr.msrb.gmra.mxu0 %v1340_v49  ;;  %1362 = vmatmul.bf16.vlgmr.msrb.gmra.mxu1 %v1340_v49 }
 0x2b3   :  { %1375 = vmatmul.bf16.vlgmr.msrb.gmra.mxu2 %v1340_v49  ;;  %1388 = vmatmul.bf16.vlgmr.msrb.gmra.mxu3 %v1340_v49 }
 0x2b4   :  { %1589 = vmatpush.bf16.msrb.mxu0 %v3468_v23  ;;  %1602 = vmatpush.bf16.msrb.mxu1 %v3470_v27 }
 0x2b5   :  { %1615 = vmatpush.bf16.msrb.mxu2 %v3472_v28  ;;  %1628 = vmatpush.bf16.msrb.mxu3 %v3483_v42 }
 0x2b8   :  { %1590 = vmatpush.bf16.msrb.mxu0 %v3475_v32  ;;  %1603 = vmatpush.bf16.msrb.mxu1 %v3479_v37 }
 0x2b9   :  { %1616 = vmatpush.bf16.msrb.mxu2 %v3481_v38  ;;  %1629 = vmatpush.bf16.msrb.mxu3 %v3516_v63 }
 0x2bc   :  { %1591 = vmatpush.bf16.msrb.mxu0 %v3509_v54  ;;  %1604 = vmatpush.bf16.msrb.mxu1 %v3511_v58 }
 0x2bd   :  { %1617 = vmatpush.bf16.msrb.mxu2 %v3513_v59  ;;  %1630 = vmatpush.bf16.msrb.mxu3 %v3527_v10 }
 0x2c0   :  { %1592 = vmatpush.bf16.msrb.mxu0 %v3520_v3  ;;  %1605 = vmatpush.bf16.msrb.mxu1 %v3522_v4 }
 0x2c1   :  { %1618 = vmatpush.bf16.msrb.mxu2 %v3525_v8  ;;  %1631 = vmatpush.bf16.msrb.mxu3 %v3544_v44 }
 0x2c4   :  { %1593 = vmatpush.bf16.msrb.mxu0 %v3537_v14  ;;  %1606 = vmatpush.bf16.msrb.mxu1 %v3539_v20 }
 0x2c5   :  { %1619 = vmatpush.bf16.msrb.mxu2 %v3541_v21  ;;  %1632 = vmatpush.bf16.msrb.mxu3 %v3555_v43 }
 0x2c8   :  { %1594 = vmatpush.bf16.msrb.mxu0 %v3548_v30  ;;  %1607 = vmatpush.bf16.msrb.mxu1 %v3550_v31 }
 0x2c9   :  { %1620 = vmatpush.bf16.msrb.mxu2 %v3553_v40  ;;  %1633 = vmatpush.bf16.msrb.mxu3 %v3572_v34 }
 0x2cc   :  { %1595 = vmatpush.bf16.msrb.mxu0 %v3565_v51  ;;  %1608 = vmatpush.bf16.msrb.mxu1 %v3567_v56 }
 0x2cd   :  { %1621 = vmatpush.bf16.msrb.mxu2 %v3569_v57  ;;  %1634 = vmatpush.bf16.msrb.mxu3 %v3581_v9 }
 0x2d0   :  { %1596 = vmatpush.bf16.msrb.mxu0 %v3576_v2  ;;  %1609 = vmatpush.bf16.msrb.mxu1 %v3578_v5 }
 0x2d1   :  { %1622 = vmatpush.bf16.msrb.mxu2 %v3588_v15  ;;  %1635 = vmatpush.bf16.msrb.mxu3 %v3590_v17 }
 0x32f   :  { %v1350_v45 = vpop.f32.mrf.mxu0  ;;  %v1363_v50 = vpop.f32.mrf.mxu1 }
 0x330   :  { %v1393_v60 = vadd.f32 %v1350_v45, %v552_v39  ;;  %v1394_v33 = vadd.f32 %v1363_v50, %v610_v24 }
 0x332   :  { %v2567_v16 = vmul.f32 -1.442695, %v1393_v60  ;;  %v2568_v7 = vmul.f32 -1.442695, %v1394_v33 }
 0x334   :  { %2821 = vpow2.f32 %v2567_v16 }
 0x335   :  { %2823 = vpow2.f32 %v2568_v7 }
 0x336   :  { %v1376_v13 = vpop.f32.mrf.mxu2  ;;  %v1389_v0 = vpop.f32.mrf.mxu3 }
 0x337   :  { %v1395_v1 = vadd.f32 %v1376_v13, %v4097_v6  ;;  %v1352_v12 = vpop.f32.mrf.mxu0  ;;  %v1365_v53 = vpop.f32.mrf.mxu1  ;;  %v1396_v41 = vadd.f32 %v1389_v0, %v4098_v19 }
 0x339   :  { %v2569_v52 = vmul.f32 -1.442695, %v1395_v1 }
 0x33a   :  { %v2822_v29 = vpop.eup %2821 }
 0x33b   :  { %v2824_v61 = vpop.eup %2823  ;;  %v1406_v11 = vadd.f32 1.0, %v2822_v29  ;;  %2825 = vpow2.f32 %v2569_v52 }
 0x33c   :  { %v1407_v18 = vadd.f32 1.0, %v2824_v61 }
 0x33d   :  { %2827 = vrcp.f32 %v1406_v11  ;;  %v1420_v50 = vand.u32 2147483648, %v1406_v11  ;;  %v1418_v16 = vand.u32 2147483647, %v1406_v11  ;;  %vm1414_vm6 = vweird.f32 %v1406_v11 }
 0x33e   :  { %2829 = vrcp.f32 %v1407_v18  ;;  %v1378_v36 = vpop.f32.mrf.mxu2  ;;  %v1391_v46 = vpop.f32.mrf.mxu3  ;;  %v1435_v60 = vand.u32 2147483648, %v1407_v18  ;;  %v1433_v13 = vand.u32 2147483647, %v1407_v18  ;;  %vm1429_vm7 = vweird.f32 %v1407_v18 }
 0x33f   :  { %v1421_v12 = vor.u32 1.1754944e-38, %v1420_v50  ;;  %vm1419_vm10 = vcmp.eq.f32.partialorder %v1418_v16, 8.507059e+37 }
 0x340   :  { %v1436_v52 = vor.u32 1.1754944e-38, %v1435_v60  ;;  %vm1434_vm11 = vcmp.eq.f32.partialorder %v1433_v13, 8.507059e+37 }
 0x341   :  { %v2826_v49 = vpop.eup %2825 }
 0x342   :  { %v1408_v35 = vadd.f32 1.0, %v2826_v49 }
 0x343   :  { %v2828_v62 = vpop.eup %2827 }
 0x344   :  { %v2830_v47 = vpop.eup %2829  ;;  %v1410_v39 = vmul.f32 %v2828_v62, %v1406_v11  ;;  %2831 = vrcp.f32 %v1408_v35  ;;  %vm1415_vm4 = vweird.f32 %v2828_v62  ;;  %vm1444_vm13 = vweird.f32 %v1408_v35 }
 0x345   :  { %v1425_v55 = vmul.f32 %v2830_v47, %v1407_v18  ;;  %2833 = vtanh.f32 %v1396_v41  ;;  %vm1430_vm5 = vweird.f32 %v2830_v47  ;;  %vm1416_vm8 = vmor %vm1414_vm6, %vm1415_vm4 }
 0x346   :  { %v1411_v24 = vsub.f32 1.0, %v1410_v39  ;;  %vm1431_vm9 = vmor %vm1429_vm7, %vm1430_vm5 }
 0x347   :  { %v1426_v45 = vsub.f32 1.0, %v1425_v55 }
 0x348   :  { %v1412_v33 = vmul.f32 %v2828_v62, %v1411_v24  ;;  %v1450_v24 = vand.u32 2147483648, %v1408_v35 }
 0x349   :  { %v1427_v7 = vmul.f32 %v2830_v47, %v1426_v45 }
 0x34a   :  { %v2832_v6 = vpop.eup %2831  ;;  %v1413_v1 = vadd.f32 %v2828_v62, %v1412_v33  ;;  %v1451_v50 = vor.u32 1.1754944e-38, %v1450_v24 }
 0x34b   :  { %v1440_v0 = vmul.f32 %v2832_v6, %v1408_v35  ;;  %v1428_v53 = vadd.f32 %v2830_v47, %v1427_v7  ;;  %v2834_v61 = vpop.eup %2833  ;;  %vm1445_vm12 = vweird.f32 %v2832_v6  ;;  %v4099_v7 = vld [vmem:[#allocation15_spill] sm:$0xff] }
 0x34c   :  { %v1417_v29 = vsel %vm1416_vm8, %v2828_v62, %v1413_v1  ;;  %v1448_v62 = vand.u32 2147483647, %v1408_v35  ;;  %vm1446_vm14 = vmor %vm1444_vm13, %vm1445_vm12 }
 0x34d   :  { %v1441_v36 = vsub.f32 1.0, %v1440_v0  ;;  %v1422_v46 = vsel %vm1419_vm10, %v1421_v12, %v1417_v29  ;;  %v1432_v49 = vsel %vm1431_vm9, %v2830_v47, %v1428_v53  ;;  %v4101_v29 = vld [vmem:[#allocation34_spill] sm:$0xff] }
 0x34e   :  { %v1437_v19 = vsel %vm1434_vm11, %v1436_v52, %v1432_v49  ;;  %v1456_v41 = vmul.f32 %v2834_v61, %v1422_v46  ;;  %vm1449_vm15 = vcmp.eq.f32.partialorder %v1448_v62, 8.507059e+37 }
 0x34f   :  { %v1442_v39 = vmul.f32 %v2832_v6, %v1441_v36  ;;  %v1455_v55 = vmul.f32 %v1437_v19, %v3878_v22 }
 0x351   :  { %v3922_v11 = vadd.f32 %v1456_v41, %v1455_v55  ;;  %v1443_v18 = vadd.f32 %v2832_v6, %v1442_v39 }
 0x353   :  { %2835 = vtanh.f32 %v3922_v11  ;;  %v1447_v45 = vsel %vm1446_vm14, %v2832_v6, %v1443_v18  ;;  %v4100_v6 = vld [vmem:[#allocation18_spill] sm:$0xff] }
 0x354   :  { %v1452_v60 = vsel %vm1449_vm15, %v1451_v50, %v1447_v45 }
 0x359   :  { %v2836_v47 = vpop.eup %2835 }
 0x35a   :  { %v1459_v33 = vmul.f32 %v2836_v47, %v1452_v60  ;;  %v4102_v47 = vld [vmem:[#allocation35_spill] sm:$0xff] }
 0x35c   :  { %v1464_v16 = vpack.c.bf16 %v1459_v33, %v1459_v33 }
 0x35e   :  { %1473 = vmatmul.bf16.vlgmr.msra.gmra.mxu0 %v1464_v16  ;;  %1486 = vmatmul.bf16.vlgmr.msra.gmra.mxu1 %v1464_v16 }
 0x35f   :  { %1499 = vmatmul.bf16.vlgmr.msra.gmra.mxu2 %v1464_v16  ;;  %1512 = vmatmul.bf16.vlgmr.msra.gmra.mxu3 %v1464_v16 }
 0x360   :  { %1713 = vmatpush.bf16.msra.mxu0 %v3468_v23  ;;  %1726 = vmatpush.bf16.msra.mxu1 %v3470_v27 }
 0x361   :  { %1739 = vmatpush.bf16.msra.mxu2 %v3472_v28  ;;  %1752 = vmatpush.bf16.msra.mxu3 %v3483_v42 }
 0x364   :  { %1714 = vmatpush.bf16.msra.mxu0 %v3475_v32  ;;  %1727 = vmatpush.bf16.msra.mxu1 %v3479_v37 }
 0x365   :  { %1740 = vmatpush.bf16.msra.mxu2 %v3481_v38  ;;  %1753 = vmatpush.bf16.msra.mxu3 %v3516_v63 }
 0x368   :  { %1715 = vmatpush.bf16.msra.mxu0 %v3509_v54  ;;  %1728 = vmatpush.bf16.msra.mxu1 %v3511_v58 }
 0x369   :  { %1741 = vmatpush.bf16.msra.mxu2 %v3513_v59  ;;  %1754 = vmatpush.bf16.msra.mxu3 %v3527_v10 }
 0x36c   :  { %1716 = vmatpush.bf16.msra.mxu0 %v3520_v3  ;;  %1729 = vmatpush.bf16.msra.mxu1 %v3522_v4 }
 0x36d   :  { %1742 = vmatpush.bf16.msra.mxu2 %v3525_v8  ;;  %1755 = vmatpush.bf16.msra.mxu3 %v3544_v44 }
 0x370   :  { %1717 = vmatpush.bf16.msra.mxu0 %v3537_v14  ;;  %1730 = vmatpush.bf16.msra.mxu1 %v3539_v20 }
 0x371   :  { %1743 = vmatpush.bf16.msra.mxu2 %v3541_v21  ;;  %1756 = vmatpush.bf16.msra.mxu3 %v3555_v43 }
 0x374   :  { %1718 = vmatpush.bf16.msra.mxu0 %v3548_v30  ;;  %1731 = vmatpush.bf16.msra.mxu1 %v3550_v31 }
 0x375   :  { %1744 = vmatpush.bf16.msra.mxu2 %v3553_v40  ;;  %1757 = vmatpush.bf16.msra.mxu3 %v3572_v34 }
 0x378   :  { %1719 = vmatpush.bf16.msra.mxu0 %v3565_v51  ;;  %1732 = vmatpush.bf16.msra.mxu1 %v3567_v56 }
 0x379   :  { %1745 = vmatpush.bf16.msra.mxu2 %v3569_v57  ;;  %1758 = vmatpush.bf16.msra.mxu3 %v3581_v9 }
 0x37c   :  { %1720 = vmatpush.bf16.msra.mxu0 %v3576_v2  ;;  %1733 = vmatpush.bf16.msra.mxu1 %v3578_v5 }
 0x37d   :  { %1746 = vmatpush.bf16.msra.mxu2 %v3588_v15  ;;  %1759 = vmatpush.bf16.msra.mxu3 %v3590_v17 }
 0x3db   :  { %v1474_v22 = vpop.f32.mrf.mxu0  ;;  %v1487_v35 = vpop.f32.mrf.mxu1 }
 0x3dc   :  { %v1517_v13 = vadd.f32 %v1474_v22, %v4099_v7  ;;  %v1518_v1 = vadd.f32 %v1487_v35, %v4100_v6 }
 0x3de   :  { %v2570_v0 = vmul.f32 -1.442695, %v1517_v13  ;;  %v2571_v12 = vmul.f32 -1.442695, %v1518_v1 }
 0x3e0   :  { %2837 = vpow2.f32 %v2570_v0 }
 0x3e1   :  { %2839 = vpow2.f32 %v2571_v12 }
 0x3e2   :  { %v1500_v53 = vpop.f32.mrf.mxu2  ;;  %v1513_v52 = vpop.f32.mrf.mxu3 }
 0x3e3   :  { %v1519_v61 = vadd.f32 %v1500_v53, %v4101_v29  ;;  %v1476_v36 = vpop.f32.mrf.mxu0  ;;  %v1489_v46 = vpop.f32.mrf.mxu1  ;;  %v1520_v60 = vadd.f32 %v1513_v52, %v4102_v47 }
 0x3e5   :  { %v2572_v49 = vmul.f32 -1.442695, %v1519_v61 }
 0x3e6   :  { %v2838_v19 = vpop.eup %2837 }
 0x3e7   :  { %v2840_v41 = vpop.eup %2839  ;;  %v1530_v39 = vadd.f32 1.0, %v2838_v19  ;;  %2841 = vpow2.f32 %v2572_v49 }
 0x3e8   :  { %v1531_v55 = vadd.f32 1.0, %v2840_v41 }
 0x3e9   :  { %2843 = vrcp.f32 %v1530_v39  ;;  %v1544_v13 = vand.u32 2147483648, %v1530_v39  ;;  %v1542_v0 = vand.u32 2147483647, %v1530_v39  ;;  %vm1538_vm2 = vweird.f32 %v1530_v39 }
 0x3ea   :  { %2845 = vrcp.f32 %v1531_v55  ;;  %v1502_v18 = vpop.f32.mrf.mxu2  ;;  %v1515_v24 = vpop.f32.mrf.mxu3  ;;  %v1559_v6 = vand.u32 2147483648, %v1531_v55  ;;  %v1557_v53 = vand.u32 2147483647, %v1531_v55  ;;  %vm1553_vm3 = vweird.f32 %v1531_v55 }
 0x3eb   :  { %v1545_v36 = vor.u32 1.1754944e-38, %v1544_v13  ;;  %vm1543_vm6 = vcmp.eq.f32.partialorder %v1542_v0, 8.507059e+37 }
 0x3ec   :  { %v1560_v49 = vor.u32 1.1754944e-38, %v1559_v6  ;;  %vm1558_vm7 = vcmp.eq.f32.partialorder %v1557_v53, 8.507059e+37 }
 0x3ed   :  { %v2842_v62 = vpop.eup %2841 }
 0x3ee   :  { %v1532_v45 = vadd.f32 1.0, %v2842_v62 }
 0x3ef   :  { %v2844_v50 = vpop.eup %2843 }
 0x3f0   :  { %v2846_v33 = vpop.eup %2845  ;;  %v1534_v16 = vmul.f32 %v2844_v50, %v1530_v39  ;;  %2847 = vrcp.f32 %v1532_v45  ;;  %vm1539_vm0 = vweird.f32 %v2844_v50  ;;  %vm1568_vm9 = vweird.f32 %v1532_v45 }
 0x3f1   :  { %v1549_v22 = vmul.f32 %v2846_v33, %v1531_v55  ;;  %2849 = vtanh.f32 %v1520_v60  ;;  %vm1554_vm1 = vweird.f32 %v2846_v33  ;;  %vm1540_vm4 = vmor %vm1538_vm2, %vm1539_vm0 }
 0x3f2   :  { %v1535_v35 = vsub.f32 1.0, %v1534_v16  ;;  %vm1555_vm5 = vmor %vm1553_vm3, %vm1554_vm1 }
 0x3f3   :  { %v1550_v7 = vsub.f32 1.0, %v1549_v22 }
 0x3f4   :  { %v1536_v1 = vmul.f32 %v2844_v50, %v1535_v35  ;;  %v1574_v35 = vand.u32 2147483648, %v1532_v45 }
 0x3f5   :  { %v1551_v12 = vmul.f32 %v2846_v33, %v1550_v7 }
 0x3f6   :  { %v2848_v29 = vpop.eup %2847  ;;  %v1537_v61 = vadd.f32 %v2844_v50, %v1536_v1  ;;  %v1575_v13 = vor.u32 1.1754944e-38, %v1574_v35 }
 0x3f7   :  { %v1564_v52 = vmul.f32 %v2848_v29, %v1532_v45  ;;  %v1552_v46 = vadd.f32 %v2846_v33, %v1551_v12  ;;  %v2850_v41 = vpop.eup %2849  ;;  %vm1569_vm8 = vweird.f32 %v2848_v29 }
 0x3f8   :  { %v1541_v19 = vsel %vm1540_vm4, %v2844_v50, %v1537_v61  ;;  %v1572_v50 = vand.u32 2147483647, %v1532_v45  ;;  %vm1570_vm10 = vmor %vm1568_vm9, %vm1569_vm8 }
 0x3f9   :  { %v1565_v18 = vsub.f32 1.0, %v1564_v52  ;;  %v1546_v24 = vsel %vm1543_vm6, %v1545_v36, %v1541_v19  ;;  %v1556_v62 = vsel %vm1555_vm5, %v2846_v33, %v1552_v46 }
 0x3fa   :  { %v1561_v47 = vsel %vm1558_vm7, %v1560_v49, %v1556_v62  ;;  %v1580_v60 = vmul.f32 %v2850_v41, %v1546_v24  ;;  %vm1573_vm11 = vcmp.eq.f32.partialorder %v1572_v50, 8.507059e+37 }
 0x3fb   :  { %v1566_v16 = vmul.f32 %v2848_v29, %v1565_v18  ;;  %v1579_v22 = vmul.f32 %v1561_v47, %v3922_v11 }
 0x3fd   :  { %v3962_v39 = vadd.f32 %v1580_v60, %v1579_v22  ;;  %v1567_v55 = vadd.f32 %v2848_v29, %v1566_v16 }
 0x3ff   :  { %2851 = vtanh.f32 %v3962_v39  ;;  %v1571_v7 = vsel %vm1570_vm10, %v2848_v29, %v1567_v55 }
 0x400   :  { %v1576_v6 = vsel %vm1573_vm11, %v1575_v13, %v1571_v7 }
 0x405   :  { %v2852_v33 = vpop.eup %2851 }
 0x406   :  { %v1583_v1 = vmul.f32 %v2852_v33, %v1576_v6 }
 0x408   :  { %v1588_v0 = vpack.c.bf16 %v1583_v1, %v1583_v1 }
 0x40a   :  { %1597 = vmatmul.bf16.vlgmr.msrb.gmra.mxu0 %v1588_v0  ;;  %1610 = vmatmul.bf16.vlgmr.msrb.gmra.mxu1 %v1588_v0 }
 0x40b   :  { %1623 = vmatmul.bf16.vlgmr.msrb.gmra.mxu2 %v1588_v0  ;;  %1636 = vmatmul.bf16.vlgmr.msrb.gmra.mxu3 %v1588_v0 }
 0x40c   :  { %1850 = vmatpush.bf16.msrb.mxu1 %v3470_v27  ;;  %1837 = vmatpush.bf16.msrb.mxu0 %v3468_v23  ;;  %v4103_v23 = vld [vmem:[#allocation16_spill] sm:$0xff] }
 0x40d   :  { %1863 = vmatpush.bf16.msrb.mxu2 %v3472_v28  ;;  %1876 = vmatpush.bf16.msrb.mxu3 %v3483_v42  ;;  %v528_v27 = vadd.f32 %v4103_v23, %v3637_v48  ;;  %v4104_v28 = vld [vmem:[#allocation19_spill] sm:$0xff]  ;;  %v4106_v42 = vld [vmem:[#allocation20_spill] sm:$0xff] }
 0x410   :  { %1851 = vmatpush.bf16.msrb.mxu1 %v3479_v37  ;;  %1838 = vmatpush.bf16.msrb.mxu0 %v3475_v32  ;;  %v586_v32 = vadd.f32 %v4104_v28, %v3647_v26  ;;  %v4105_v37 = vld [vmem:[#allocation17_spill] sm:$0xff] }
 0x411   :  { %1864 = vmatpush.bf16.msrb.mxu2 %v3481_v38  ;;  %1877 = vmatpush.bf16.msrb.mxu3 %v3516_v63  ;;  %v557_v38 = vadd.f32 %v4105_v37, %v528_v27 }
 0x414   :  { %1852 = vmatpush.bf16.msrb.mxu1 %v3511_v58  ;;  %1839 = vmatpush.bf16.msrb.mxu0 %v3509_v54  ;;  %v615_v54 = vadd.f32 %v4106_v42, %v586_v32 }
 0x415   :  { %1865 = vmatpush.bf16.msrb.mxu2 %v3513_v59  ;;  %1878 = vmatpush.bf16.msrb.mxu3 %v3527_v10 }
 0x418   :  { %1853 = vmatpush.bf16.msrb.mxu1 %v3522_v4  ;;  %1840 = vmatpush.bf16.msrb.mxu0 %v3520_v3 }
 0x419   :  { %1866 = vmatpush.bf16.msrb.mxu2 %v3525_v8  ;;  %1879 = vmatpush.bf16.msrb.mxu3 %v3544_v44 }
 0x41c   :  { %1854 = vmatpush.bf16.msrb.mxu1 %v3539_v20  ;;  %1841 = vmatpush.bf16.msrb.mxu0 %v3537_v14  ;;  %v4107_v20 = vld [vmem:[#allocation36_spill] sm:$0xff] }
 0x41d   :  { %1867 = vmatpush.bf16.msrb.mxu2 %v3541_v21  ;;  %1880 = vmatpush.bf16.msrb.mxu3 %v3555_v43 }
 0x420   :  { %1855 = vmatpush.bf16.msrb.mxu1 %v3550_v31  ;;  %1842 = vmatpush.bf16.msrb.mxu0 %v3548_v30 }
 0x421   :  { %1868 = vmatpush.bf16.msrb.mxu2 %v3553_v40  ;;  %1881 = vmatpush.bf16.msrb.mxu3 %v3572_v34 }
 0x424   :  { %1856 = vmatpush.bf16.msrb.mxu1 %v3567_v56  ;;  %1843 = vmatpush.bf16.msrb.mxu0 %v3565_v51 }
 0x425   :  { %1869 = vmatpush.bf16.msrb.mxu2 %v3569_v57  ;;  %1882 = vmatpush.bf16.msrb.mxu3 %v3581_v9 }
 0x428   :  { %1857 = vmatpush.bf16.msrb.mxu1 %v3578_v5  ;;  %1844 = vmatpush.bf16.msrb.mxu0 %v3576_v2 }
 0x429   :  { %1870 = vmatpush.bf16.msrb.mxu2 %v3588_v15  ;;  %1883 = vmatpush.bf16.msrb.mxu3 %v3590_v17  ;;  %v4108_v15 = vld [vmem:[#allocation37_spill] sm:$0xff] }
 0x487   :  { %v1598_v58 = vpop.f32.mrf.mxu0  ;;  %v1611_v59 = vpop.f32.mrf.mxu1 }
 0x488   :  { %v1641_v63 = vadd.f32 %v1598_v58, %v557_v38  ;;  %v1642_v3 = vadd.f32 %v1611_v59, %v615_v54 }
 0x48a   :  { %v2573_v4 = vmul.f32 -1.442695, %v1641_v63  ;;  %v2574_v8 = vmul.f32 -1.442695, %v1642_v3  ;;  %v4109_v63 = vld [vmem:[#allocation21_spill] sm:$0xff] }
 0x48c   :  { %2853 = vpow2.f32 %v2573_v4  ;;  %v4110_v4 = vld [vmem:[#allocation24_spill] sm:$0xff] }
 0x48d   :  { %2855 = vpow2.f32 %v2574_v8 }
 0x48e   :  { %v1624_v10 = vpop.f32.mrf.mxu2  ;;  %v1637_v14 = vpop.f32.mrf.mxu3 }
 0x48f   :  { %v1643_v21 = vadd.f32 %v1624_v10, %v4107_v20  ;;  %v1600_v44 = vpop.f32.mrf.mxu0  ;;  %v1613_v30 = vpop.f32.mrf.mxu1  ;;  %v1644_v17 = vadd.f32 %v1637_v14, %v4108_v15  ;;  %v2764_v20 = vld [vmem:[#allocation5 + $0x70] sm:$0xff] }
 0x491   :  { %v2575_v31 = vmul.f32 -1.442695, %v1643_v21  ;;  %v2763_v21 = vld [vmem:[#allocation5 + $0x68] sm:$0xff] }
 0x492   :  { %v2854_v40 = vpop.eup %2853 }
 0x493   :  { %v2856_v43 = vpop.eup %2855  ;;  %v1654_v51 = vadd.f32 1.0, %v2854_v40  ;;  %2857 = vpow2.f32 %v2575_v31  ;;  %v4111_v31 = vld [vmem:[#allocation38_spill] sm:$0xff] }
 0x494   :  { %v1655_v56 = vadd.f32 1.0, %v2856_v43 }
 0x495   :  { %2859 = vrcp.f32 %v1654_v51  ;;  %v1668_v61 = vand.u32 2147483648, %v1654_v51  ;;  %v1666_v46 = vand.u32 2147483647, %v1654_v51  ;;  %vm1662_vm14 = vweird.f32 %v1654_v51 }
 0x496   :  { %2861 = vrcp.f32 %v1655_v56  ;;  %v1626_v57 = vpop.f32.mrf.mxu2  ;;  %v1639_v34 = vpop.f32.mrf.mxu3  ;;  %v1683_v52 = vand.u32 2147483648, %v1655_v56  ;;  %v1681_v19 = vand.u32 2147483647, %v1655_v56  ;;  %vm1677_vm15 = vweird.f32 %v1655_v56 }
 0x497   :  { %v1669_v62 = vor.u32 1.1754944e-38, %v1668_v61  ;;  %vm1667_vm2 = vcmp.eq.f32.partialorder %v1666_v46, 8.507059e+37  ;;  %v4112_v61 = vld [vmem:[#allocation39_spill] sm:$0xff] }
 0x498   :  { %v1684_v60 = vor.u32 1.1754944e-38, %v1683_v52  ;;  %vm1682_vm3 = vcmp.eq.f32.partialorder %v1681_v19, 8.507059e+37 }
 0x499   :  { %v2858_v2 = vpop.eup %2857 }
 0x49a   :  { %v1656_v5 = vadd.f32 1.0, %v2858_v2 }
 0x49b   :  { %v2860_v9 = vpop.eup %2859 }
 0x49c   :  { %v2862_v11 = vpop.eup %2861  ;;  %v1658_v45 = vmul.f32 %v2860_v9, %v1654_v51  ;;  %2863 = vrcp.f32 %v1656_v5  ;;  %vm1663_vm12 = vweird.f32 %v2860_v9  ;;  %v1698_v23 = vand.u32 2147483648, %v1656_v5 }
 0x49d   :  { %v1673_v12 = vmul.f32 %v2862_v11, %v1655_v56  ;;  %2865 = vtanh.f32 %v1644_v17  ;;  %vm1678_vm13 = vweird.f32 %v2862_v11  ;;  %vm1664_vm0 = vmor %vm1662_vm14, %vm1663_vm12  ;;  %vm1692_vm5 = vweird.f32 %v1656_v5  ;;  %v2762_v56 = vld [vmem:[#allocation5 + $0x60] sm:$0xff] }
 0x49e   :  { %v1659_v53 = vsub.f32 1.0, %v1658_v45  ;;  %vm1679_vm1 = vmor %vm1677_vm15, %vm1678_vm13  ;;  %v1696_v27 = vand.u32 2147483647, %v1656_v5  ;;  %v1699_v32 = vor.u32 1.1754944e-38, %v1698_v23  ;;  %v2760_v45 = vld [vmem:[#allocation5 + $0x50] sm:$0xff] }
 0x49f   :  { %v1674_v29 = vsub.f32 1.0, %v1673_v12 }
 0x4a0   :  { %v1660_v36 = vmul.f32 %v2860_v9, %v1659_v53  ;;  %vm1697_vm7 = vcmp.eq.f32.partialorder %v1696_v27, 8.507059e+37 }
 0x4a1   :  { %v1675_v49 = vmul.f32 %v2862_v11, %v1674_v29 }
 0x4a2   :  { %v2864_v41 = vpop.eup %2863  ;;  %v1661_v18 = vadd.f32 %v2860_v9, %v1660_v36 }
 0x4a3   :  { %v1688_v24 = vmul.f32 %v2864_v41, %v1656_v5  ;;  %v1676_v47 = vadd.f32 %v2862_v11, %v1675_v49  ;;  %v2866_v22 = vpop.eup %2865  ;;  %vm1693_vm4 = vweird.f32 %v2864_v41  ;;  %v2759_v49 = vld [vmem:[#allocation5 + $0x48] sm:$0xff] }
 0x4a4   :  { %v1665_v16 = vsel %vm1664_vm0, %v2860_v9, %v1661_v18  ;;  %vm1694_vm6 = vmor %vm1692_vm5, %vm1693_vm4 }
 0x4a5   :  { %v1689_v55 = vsub.f32 1.0, %v1688_v24  ;;  %v1670_v35 = vsel %vm1667_vm2, %v1669_v62, %v1665_v16  ;;  %v1680_v50 = vsel %vm1679_vm1, %v2862_v11, %v1676_v47  ;;  %v2761_v11 = vld [vmem:[#allocation5 + $0x58] sm:$0xff]  ;;  %v2758_v16 = vld [vmem:[#allocation5 + $0x40] sm:$0xff] }
 0x4a6   :  { %v1685_v7 = vsel %vm1682_vm3, %v1684_v60, %v1680_v50  ;;  %v1704_v13 = vmul.f32 %v2866_v22, %v1670_v35 }
 0x4a7   :  { %v1690_v33 = vmul.f32 %v2864_v41, %v1689_v55  ;;  %v1703_v6 = vmul.f32 %v1685_v7, %v3962_v39  ;;  %v2765_v39 = vld [vmem:[#allocation5 + $0x78] sm:$0xff] }
 0x4a9   :  { %v4006_v1 = vadd.f32 %v1704_v13, %v1703_v6  ;;  %v1691_v0 = vadd.f32 %v2864_v41, %v1690_v33 }
 0x4ab   :  { %2867 = vtanh.f32 %v4006_v1  ;;  %v1695_v28 = vsel %vm1694_vm6, %v2864_v41, %v1691_v0 }
 0x4ac   :  { %v1700_v38 = vsel %vm1697_vm7, %v1699_v32, %v1695_v28 }
 0x4b1   :  { %v2868_v37 = vpop.eup %2867 }
 0x4b2   :  { %v1707_v42 = vmul.f32 %v2868_v37, %v1700_v38 }
 0x4b4   :  { %v1712_v54 = vpack.c.bf16 %v1707_v42, %v1707_v42 }
 0x4b6   :  { %1721 = vmatmul.bf16.vlgmr.msra.gmra.mxu0 %v1712_v54  ;;  %1734 = vmatmul.bf16.vlgmr.msra.gmra.mxu1 %v1712_v54 }
 0x4b7   :  { %1747 = vmatmul.bf16.vlgmr.msra.gmra.mxu2 %v1712_v54  ;;  %1760 = vmatmul.bf16.vlgmr.msra.gmra.mxu3 %v1712_v54 }
 0x4b8   :  { %2102 = vmatpush.bf16.msra.mxu1 %v2765_v39 }
 0x4bc   :  { %2103 = vmatpush.bf16.msra.mxu1 %v2764_v20 }
 0x4c0   :  { %2104 = vmatpush.bf16.msra.mxu1 %v2763_v21  ;;  %v2756_v21 = vld [vmem:[#allocation5 + $0x30] sm:$0xff] }
 0x4c4   :  { %2105 = vmatpush.bf16.msra.mxu1 %v2762_v56  ;;  %v4115_v56 = vld [vmem:[#allocation23_spill] sm:$0xff] }
 0x4c8   :  { %2106 = vmatpush.bf16.msra.mxu1 %v2761_v11 }
 0x4cc   :  { %2107 = vmatpush.bf16.msra.mxu1 %v2760_v45 }
 0x4d0   :  { %2108 = vmatpush.bf16.msra.mxu1 %v2759_v49 }
 0x4d4   :  { %2109 = vmatpush.bf16.msra.mxu1 %v2758_v16 }
 0x533   :  { %v1722_v58 = vpop.f32.mrf.mxu0  ;;  %v1735_v59 = vpop.f32.mrf.mxu1 }
 0x534   :  { %v1765_v3 = vadd.f32 %v1722_v58, %v4109_v63  ;;  %v1766_v8 = vadd.f32 %v1735_v59, %v4110_v4 }
 0x536   :  { %v2576_v10 = vmul.f32 -1.442695, %v1765_v3  ;;  %v2577_v14 = vmul.f32 -1.442695, %v1766_v8 }
 0x538   :  { %2869 = vpow2.f32 %v2576_v10 }
 0x539   :  { %2871 = vpow2.f32 %v2577_v14 }
 0x53a   :  { %v1748_v44 = vpop.f32.mrf.mxu2  ;;  %v1761_v30 = vpop.f32.mrf.mxu3 }
 0x53b   :  { %v1767_v40 = vadd.f32 %v1748_v44, %v4111_v31  ;;  %v1724_v43 = vpop.f32.mrf.mxu0  ;;  %v1737_v51 = vpop.f32.mrf.mxu1  ;;  %v1768_v52 = vadd.f32 %v1761_v30, %v4112_v61  ;;  %v2755_v44 = vld [vmem:[#allocation5 + $0x28] sm:$0xff] }
 0x53c   :  { %v4113_v30 = vld [vmem:[#allocation22_spill] sm:$0xff]  ;;  %v2754_v51 = vld [vmem:[#allocation5 + $0x20] sm:$0xff] }
 0x53d   :  { %v2578_v57 = vmul.f32 -1.442695, %v1767_v40  ;;  %v533_v31 = vadd.f32 %v4113_v30, %v3637_v48  ;;  %v4114_v40 = vld [vmem:[#allocation25_spill] sm:$0xff]  ;;  %v2751_v48 = vld [vmem:[#allocation5 + $0x8] sm:$0xff] }
 0x53e   :  { %v2870_v34 = vpop.eup %2869  ;;  %v591_v43 = vadd.f32 %v4114_v40, %v3647_v26 }
 0x53f   :  { %v2872_v2 = vpop.eup %2871  ;;  %v1778_v5 = vadd.f32 1.0, %v2870_v34  ;;  %2873 = vpow2.f32 %v2578_v57  ;;  %v562_v57 = vadd.f32 %v4115_v56, %v533_v31  ;;  %v4116_v34 = vld [vmem:[#allocation26_spill] sm:$0xff] }
 0x540   :  { %v1779_v9 = vadd.f32 1.0, %v2872_v2  ;;  %v620_v2 = vadd.f32 %v4116_v34, %v591_v43 }
 0x541   :  { %2875 = vrcp.f32 %v1778_v5  ;;  %v1792_v24 = vand.u32 2147483648, %v1778_v5  ;;  %v1790_v60 = vand.u32 2147483647, %v1778_v5  ;;  %vm1786_vm10 = vweird.f32 %v1778_v5 }
 0x542   :  { %2877 = vrcp.f32 %v1779_v9  ;;  %v1750_v15 = vpop.f32.mrf.mxu2  ;;  %v1763_v17 = vpop.f32.mrf.mxu3  ;;  %v1807_v62 = vand.u32 2147483648, %v1779_v9  ;;  %v1805_v55 = vand.u32 2147483647, %v1779_v9  ;;  %vm1801_vm11 = vweird.f32 %v1779_v9 }
 0x543   :  { %v1793_v13 = vor.u32 1.1754944e-38, %v1792_v24  ;;  %vm1791_vm14 = vcmp.eq.f32.partialorder %v1790_v60, 8.507059e+37 }
 0x544   :  { %v1808_v6 = vor.u32 1.1754944e-38, %v1807_v62  ;;  %vm1806_vm15 = vcmp.eq.f32.partialorder %v1805_v55, 8.507059e+37 }
 0x545   :  { %v2874_v12 = vpop.eup %2873 }
 0x546   :  { %v1780_v53 = vadd.f32 1.0, %v2874_v12  ;;  %v2752_v12 = vld [vmem:[#allocation5 + $0x10] sm:$0xff] }
 0x547   :  { %v2876_v29 = vpop.eup %2875 }
 0x548   :  { %v2878_v36 = vpop.eup %2877  ;;  %v1782_v46 = vmul.f32 %v2876_v29, %v1778_v5  ;;  %2879 = vrcp.f32 %v1780_v53  ;;  %vm1787_vm8 = vweird.f32 %v2876_v29  ;;  %v1822_v59 = vand.u32 2147483648, %v1780_v53  ;;  %v2753_v5 = vld [vmem:[#allocation5 + $0x18] sm:$0xff] }
 0x549   :  { %v1797_v19 = vmul.f32 %v2878_v36, %v1779_v9  ;;  %2881 = vtanh.f32 %v1768_v52  ;;  %vm1802_vm9 = vweird.f32 %v2878_v36  ;;  %vm1788_vm12 = vmor %vm1786_vm10, %vm1787_vm8  ;;  %vm1816_vm1 = vweird.f32 %v1780_v53 }
 0x54a   :  { %v1783_v41 = vsub.f32 1.0, %v1782_v46  ;;  %vm1803_vm13 = vmor %vm1801_vm11, %vm1802_vm9  ;;  %v1820_v63 = vand.u32 2147483647, %v1780_v53  ;;  %v1823_v4 = vor.u32 1.1754944e-38, %v1822_v59  ;;  %v2750_v46 = vld [vmem:[#allocation5] sm:$0xff] }
 0x54b   :  { %v1798_v18 = vsub.f32 1.0, %v1797_v19 }
 0x54c   :  { %v1784_v47 = vmul.f32 %v2876_v29, %v1783_v41  ;;  %vm1821_vm3 = vcmp.eq.f32.partialorder %v1820_v63, 8.507059e+37 }
 0x54d   :  { %v1799_v22 = vmul.f32 %v2878_v36, %v1798_v18 }
 0x54e   :  { %v2880_v35 = vpop.eup %2879  ;;  %v1785_v50 = vadd.f32 %v2876_v29, %v1784_v47 }
 0x54f   :  { %v1812_v7 = vmul.f32 %v2880_v35, %v1780_v53  ;;  %v1800_v33 = vadd.f32 %v2878_v36, %v1799_v22  ;;  %v2882_v23 = vpop.eup %2881  ;;  %vm1817_vm0 = vweird.f32 %v2880_v35 }
 0x550   :  { %v1789_v0 = vsel %vm1788_vm12, %v2876_v29, %v1785_v50  ;;  %vm1818_vm2 = vmor %vm1816_vm1, %vm1817_vm0  ;;  %v4117_v29 = vld [vmem:[#allocation40_spill] sm:$0xff] }
 0x551   :  { %v1813_v27 = vsub.f32 1.0, %v1812_v7  ;;  %v1794_v28 = vsel %vm1791_vm14, %v1793_v13, %v1789_v0  ;;  %v1804_v32 = vsel %vm1803_vm13, %v2878_v36, %v1800_v33 }
 0x552   :  { %v1809_v37 = vsel %vm1806_vm15, %v1808_v6, %v1804_v32  ;;  %v1828_v38 = vmul.f32 %v2882_v23, %v1794_v28 }
 0x553   :  { %v1814_v42 = vmul.f32 %v2880_v35, %v1813_v27  ;;  %v1827_v54 = vmul.f32 %v1809_v37, %v4006_v1  ;;  %v2757_v1 = vld [vmem:[#allocation5 + $0x38] sm:$0xff] }
 0x554   :  { %2089 = vmatpush.bf16.msra.mxu0 %v2757_v1 }
 0x555   :  { %v4014_v39 = vadd.f32 %v1828_v38, %v1827_v54  ;;  %v1815_v58 = vadd.f32 %v2880_v35, %v1814_v42 }
 0x557   :  { %2883 = vtanh.f32 %v4014_v39  ;;  %v1819_v3 = vsel %vm1818_vm2, %v2880_v35, %v1815_v58  ;;  %v4118_v35 = vld [vmem:[#allocation41_spill] sm:$0xff] }
 0x558   :  { %v1824_v10 = vsel %vm1821_vm3, %v1823_v4, %v1819_v3  ;;  %2090 = vmatpush.bf16.msra.mxu0 %v2756_v21 }
 0x55c   :  { %2091 = vmatpush.bf16.msra.mxu0 %v2755_v44 }
 0x55d   :  { %v2884_v8 = vpop.eup %2883 }
 0x55e   :  { %v1831_v14 = vmul.f32 %v2884_v8, %v1824_v10 }
 0x560   :  { %v1836_v20 = vpack.c.bf16 %v1831_v14, %v1831_v14  ;;  %2092 = vmatpush.bf16.msra.mxu0 %v2754_v51 }
 0x562   :  { %1845 = vmatmul.bf16.vlgmr.msrb.gmra.mxu0 %v1836_v20  ;;  %1858 = vmatmul.bf16.vlgmr.msrb.gmra.mxu1 %v1836_v20 }
 0x563   :  { %1871 = vmatmul.bf16.vlgmr.msrb.gmra.mxu2 %v1836_v20  ;;  %1884 = vmatmul.bf16.vlgmr.msrb.gmra.mxu3 %v1836_v20 }
 0x564   :  { %2093 = vmatpush.bf16.msra.mxu0 %v2753_v5 }
 0x568   :  { %2094 = vmatpush.bf16.msra.mxu0 %v2752_v12 }
 0x56c   :  { %2095 = vmatpush.bf16.msra.mxu0 %v2751_v48 }
 0x570   :  { %2096 = vmatpush.bf16.msra.mxu0 %v2750_v46 }
 0x572   :  { %2110 = vmatmul.bf16.vlgmr.msra.gmra.mxu1 %v3789_v25 }
 0x5df   :  { %v1846_v25 = vpop.f32.mrf.mxu0  ;;  %v1859_v9 = vpop.f32.mrf.mxu1 }
 0x5e0   :  { %v1889_v15 = vadd.f32 %v1846_v25, %v562_v57  ;;  %v1890_v17 = vadd.f32 %v1859_v9, %v620_v2 }
 0x5e2   :  { %v2579_v11 = vmul.f32 -1.442695, %v1889_v15  ;;  %v2580_v45 = vmul.f32 -1.442695, %v1890_v17 }
 0x5e4   :  { %2885 = vpow2.f32 %v2579_v11 }
 0x5e5   :  { %2887 = vpow2.f32 %v2580_v45 }
 0x5e6   :  { %v1872_v26 = vpop.f32.mrf.mxu2  ;;  %v1885_v53 = vpop.f32.mrf.mxu3 }
 0x5e7   :  { %v1891_v61 = vadd.f32 %v1872_v26, %v4117_v29  ;;  %v1848_v52 = vpop.f32.mrf.mxu0  ;;  %v1861_v36 = vpop.f32.mrf.mxu1  ;;  %v1892_v50 = vadd.f32 %v1885_v53, %v4118_v35 }
 0x5e9   :  { %v2581_v49 = vmul.f32 -1.442695, %v1891_v61 }
 0x5ea   :  { %v2886_v19 = vpop.eup %2885 }
 0x5eb   :  { %v2888_v41 = vpop.eup %2887  ;;  %v1902_v18 = vadd.f32 1.0, %v2886_v19  ;;  %2889 = vpow2.f32 %v2581_v49 }
 0x5ec   :  { %v1903_v24 = vadd.f32 1.0, %v2888_v41 }
 0x5ed   :  { %2891 = vrcp.f32 %v1902_v18  ;;  %v1916_v23 = vand.u32 2147483648, %v1902_v18  ;;  %v1914_v37 = vand.u32 2147483647, %v1902_v18  ;;  %vm1910_vm6 = vweird.f32 %v1902_v18 }
 0x5ee   :  { %2893 = vrcp.f32 %v1903_v24  ;;  %v1874_v62 = vpop.f32.mrf.mxu2  ;;  %v1887_v47 = vpop.f32.mrf.mxu3  ;;  %v1931_v28 = vand.u32 2147483648, %v1903_v24  ;;  %v1929_v42 = vand.u32 2147483647, %v1903_v24  ;;  %vm1925_vm7 = vweird.f32 %v1903_v24 }
 0x5ef   :  { %v4025_v60 = vpop.f32.mrf.mxu1  ;;  %v1917_v63 = vor.u32 1.1754944e-38, %v1916_v23  ;;  %vm1915_vm10 = vcmp.eq.f32.partialorder %v1914_v37, 8.507059e+37 }
 0x5f0   :  { %v1932_v4 = vor.u32 1.1754944e-38, %v1931_v28  ;;  %vm1930_vm11 = vcmp.eq.f32.partialorder %v1929_v42, 8.507059e+37 }
 0x5f1   :  { %v2890_v16 = vpop.eup %2889 }
 0x5f2   :  { %v1904_v22 = vadd.f32 1.0, %v2890_v16 }
 0x5f3   :  { %v2892_v55 = vpop.eup %2891 }
 0x5f4   :  { %v2894_v7 = vpop.eup %2893  ;;  %v1906_v13 = vmul.f32 %v2892_v55, %v1902_v18  ;;  %2895 = vrcp.f32 %v1904_v22  ;;  %vm1911_vm4 = vweird.f32 %v2892_v55  ;;  %v1946_v51 = vand.u32 2147483648, %v1904_v22 }
 0x5f5   :  { %v1921_v33 = vmul.f32 %v2894_v7, %v1903_v24  ;;  %2897 = vtanh.f32 %v1892_v50  ;;  %vm1926_vm5 = vweird.f32 %v2894_v7  ;;  %vm1912_vm8 = vmor %vm1910_vm6, %vm1911_vm4  ;;  %vm1940_vm13 = vweird.f32 %v1904_v22 }
 0x5f6   :  { %v1907_v6 = vsub.f32 1.0, %v1906_v13  ;;  %vm1927_vm9 = vmor %vm1925_vm7, %vm1926_vm5  ;;  %v1944_v56 = vand.u32 2147483647, %v1904_v22  ;;  %v1947_v34 = vor.u32 1.1754944e-38, %v1946_v51 }
 0x5f7   :  { %v1922_v0 = vsub.f32 1.0, %v1921_v33  ;;  %v2113_v27 = vpop.f32.mrf.mxu1 }
 0x5f8   :  { %v1908_v32 = vmul.f32 %v2892_v55, %v1907_v6  ;;  %vm1945_vm15 = vcmp.eq.f32.partialorder %v1944_v56, 8.507059e+37 }
 0x5f9   :  { %v1923_v38 = vmul.f32 %v2894_v7, %v1922_v0 }
 0x5fa   :  { %v2896_v54 = vpop.eup %2895  ;;  %v1909_v58 = vadd.f32 %v2892_v55, %v1908_v32 }
 0x5fb   :  { %v1936_v59 = vmul.f32 %v2896_v54, %v1904_v22  ;;  %v1924_v3 = vadd.f32 %v2894_v7, %v1923_v38  ;;  %v2898_v10 = vpop.eup %2897  ;;  %vm1941_vm12 = vweird.f32 %v2896_v54 }
 0x5fc   :  { %v1913_v8 = vsel %vm1912_vm8, %v2892_v55, %v1909_v58  ;;  %vm1942_vm14 = vmor %vm1940_vm13, %vm1941_vm12 }
 0x5fd   :  { %v1937_v14 = vsub.f32 1.0, %v1936_v59  ;;  %v1918_v20 = vsel %vm1915_vm10, %v1917_v63, %v1913_v8  ;;  %v1928_v1 = vsel %vm1927_vm9, %v2894_v7, %v1924_v3 }
 0x5fe   :  { %v1933_v21 = vsel %vm1930_vm11, %v1932_v4, %v1928_v1  ;;  %v1952_v44 = vmul.f32 %v2898_v10, %v1918_v20 }
 0x5ff   :  { %v1938_v30 = vmul.f32 %v2896_v54, %v1937_v14  ;;  %v1951_v31 = vmul.f32 %v1933_v21, %v4014_v39  ;;  %v2772_v39 = vld [vmem:[%s4049_s7] ss:$0 sm:$0xff] }
 0x601   :  { %v1953_v40 = vadd.f32 %v1952_v44, %v1951_v31  ;;  %v1939_v43 = vadd.f32 %v2896_v54, %v1938_v30 }
 0x603   :  { %2899 = vtanh.f32 %v1953_v40  ;;  %2127 = vst [vmem:[%s4052_s10] sm:$0xff] %v1953_v40  ;;  %v1943_v57 = vsel %vm1942_vm14, %v2896_v54, %v1939_v43 }
 0x604   :  { %v1948_v5 = vsel %vm1945_vm15, %v1947_v34, %v1943_v57 }
 0x609   :  { %v2900_v2 = vpop.eup %2899 }
 0x60a   :  { %v1955_v25 = vmul.f32 %v2900_v2, %v1948_v5 }
 0x60c   :  { %v1956_v9 = vpack.c.bf16 %v1955_v25, %v1955_v25  ;;  %2126 = vst [vmem:[%s4051_s9] sm:$0xff] %v1955_v25 }
 0x60e   :  { %2097 = vmatmul.bf16.vlgmr.msra.gmra.mxu0 %v1956_v9 }
 0x68b   :  { %v2098_v15 = vpop.f32.mrf.mxu0 }
 0x68c   :  { %v2099_v17 = vadd.f32 %v2772_v39, %v2098_v15 }
 0x68e   :  { %v2112_v11 = vadd.f32 %v4025_v60, %v2099_v17 }
 0x690   :  { %2115 = vmax.xlane.f32.xlu0 %v2112_v11 }
 0x693   :  { %v2100_v45 = vpop.f32.mrf.mxu0 }
 0x703   :  { %v2116_v12 = vpop.xlane.xlu0 %2115 }
 0x704   :  { %v2117_v48 = vsub.f32 %v2112_v11, %v2116_v12 }
 0x706   :  { %v2118_v26 = vmul.f32 1.442695, %v2117_v48 }
 0x708   :  { %2901 = vpow2.f32 %v2118_v26 }
 0x70e   :  { %v2902_v53 = vpop.eup %2901 }
 0x70f   :  { %2120 = vadd.xlane.f32.xlu0 %v2902_v53 }
 0x782   :  { %v2121_v29 = vpop.xlane.xlu0 %2120 }
 0x783   :  { %2903 = vlog2.f32 %v2121_v29 }
 0x789   :  { %v2904_v61 = vpop.eup %2903 }
 0x78a   :  { %v2123_v52 = vmul.f32 0.6931472, %v2904_v61 }
 0x78c   :  { %v2124_v36 = vsub.f32 %v2117_v48, %v2123_v52 }
 0x78e   :  { %2125 = vst [vmem:[%s4050_s8] sm:$0xff] %v2124_v36 }
 0x78f   :  { %2140 = vsyncpa [#allocation4], 1 }
 0x790   :  { %2141 = vsyncpa [#allocation6], 1 }

</bundles_post_ra>
